<compile_context>
chip_gen: v6e
topology: v6e:2x2x1
jax: 0.10.0
libtpu: 0.0.40
codegen_flags: <defaults>
</compile_context>

<pallas_src>
import functools

import jax
import jax.numpy as jnp
from jax.experimental import pallas as pl
from jax.experimental.pallas import tpu as pltpu

LN_EPS = 1e-5  # PyTorch nn.LayerNorm default


# ----------------------------- helpers ---------------------------------------

def _pick_tile(dim, candidates):
    """Largest candidate that evenly divides `dim`; fall back to full dim."""
    for c in candidates:
        if dim >= c and dim % c == 0:
            return c
    return dim


_TM_CAND = (256, 128, 64, 32, 16, 8)
_TN_CAND = (512, 256, 128)
_TK_CAND = (512, 256, 128)


def _layernorm_f32(x, g, b):
    mu = jnp.mean(x, axis=-1, keepdims=True)
    var = jnp.mean(jnp.square(x - mu), axis=-1, keepdims=True)
    return (x - mu) * jax.lax.rsqrt(var + LN_EPS) * g + b


# ----------------------------- kernels ---------------------------------------

def _patch_embed_kernel(p_ref, w_ref, a_ref, o_ref):
    # p: (1, S, Cpp) bf16 (row 0 is zeros -> cls slot), w: (Cpp, TN) bf16,
    # a: (S, TN) f32 additive table (cls+pos0 / patch_bias+pos).
    h = jnp.dot(p_ref[0], w_ref[...], preferred_element_type=jnp.float32)
    o_ref[0] = (h + a_ref[...].astype(jnp.float32)).astype(o_ref.dtype)


def _ln_mm_kernel(x_ref, g_ref, beta_ref, w_ref, b_ref, o_ref, *, gelu):
    # LayerNorm (f32) fused with the matmul that consumes it.  K is un-tiled
    # (full feature row needed for mean/var); M/N are tiled by the grid.
    xf = x_ref[...].astype(jnp.float32)
    hn = _layernorm_f32(xf, g_ref[...].astype(jnp.float32),
                        beta_ref[...].astype(jnp.float32))
    out = (jnp.dot(hn.astype(w_ref.dtype), w_ref[...],
                   preferred_element_type=jnp.float32)
           + b_ref[...].astype(jnp.float32))
    if gelu:
        # TODO(synk): PyTorch nn.GELU is the exact erf form; tanh approximation
        # is used because erf lowering on Mosaic is not guaranteed.
        out = jax.nn.gelu(out, approximate=True)
    o_ref[...] = out.astype(o_ref.dtype)


def _mm_bias_res_kernel(x_ref, w_ref, b_ref, r_ref, o_ref, acc_ref, *, n_k):
    # K-tiled matmul with f32 accumulator; bias + residual added at finalize.
    k = pl.program_id(2)

    @pl.when(k == 0)
    def _():
        acc_ref[...] = jnp.zeros_like(acc_ref)

    acc_ref[...] += jnp.dot(x_ref[...], w_ref[...],
                            preferred_element_type=jnp.float32)

    @pl.when(k == n_k - 1)
    def _():
        o_ref[...] = (acc_ref[...]
                      + b_ref[...].astype(jnp.float32)
                      + r_ref[...].astype(jnp.float32)).astype(o_ref.dtype)


def _attn_proj_kernel(q_ref, k_ref, v_ref, w_ref, b_ref, x_ref, o_ref,
                      *, n_heads, scale):
    # One batch element per grid step.  q/k/v are column windows of the same
    # (B, S, 3D) qkv tensor (no XLA transposes).  The output projection and
    # residual add are fused: acc += softmax(q k^T) v @ W_proj[h*hd:(h+1)*hd].
    S, D = q_ref.shape[1], q_ref.shape[2]
    hd = D // n_heads
    acc = x_ref[0].astype(jnp.float32) + b_ref[...].astype(jnp.float32)  # (S, D)
    for h in range(n_heads):
        lo, hi = h * hd, (h + 1) * hd
        qh = q_ref[0, :, lo:hi]                      # (S, hd) bf16
        kh = k_ref[0, :, lo:hi]
        vh = v_ref[0, :, lo:hi]
        s = jax.lax.dot_general(qh, kh, (((1,), (1,)), ((), ())),
                                preferred_element_type=jnp.float32) * scale
        m = jnp.max(s, axis=-1, keepdims=True)
        e = jnp.exp(s - m)
        p = (e * pl.reciprocal(jnp.sum(e, axis=-1, keepdims=True),
                               approx=True)).astype(vh.dtype)
        oh = jnp.dot(p, vh, preferred_element_type=jnp.float32)     # (S, hd)
        acc = acc + jnp.dot(oh.astype(w_ref.dtype), w_ref[lo:hi, :],
                            preferred_element_type=jnp.float32)
    o_ref[0] = acc.astype(o_ref.dtype)


# ----------------------------- wrappers ---------------------------------------

def patch_embed(patches, w, addin, out_dtype=jnp.bfloat16):
    B, S, Cpp = patches.shape
    D = w.shape[1]
    TN = _pick_tile(D, _TN_CAND)
    return pl.pallas_call(
        _patch_embed_kernel,
        grid=(B, D // TN),
        in_specs=[
            pl.BlockSpec((1, S, Cpp), lambda b, j: (b, 0, 0)),
            pl.BlockSpec((Cpp, TN), lambda b, j: (0, j)),
            pl.BlockSpec((S, TN), lambda b, j: (0, j)),
        ],
        out_specs=pl.BlockSpec((1, S, TN), lambda b, j: (b, 0, j)),
        out_shape=jax.ShapeDtypeStruct((B, S, D), out_dtype),
        compiler_params=pltpu.CompilerParams(
            dimension_semantics=("parallel", "parallel")),
    )(patches, w, addin)


def ln_matmul_bias(x, g, beta, w, b, *, gelu, out_dtype=jnp.bfloat16):
    M, K = x.shape
    N = w.shape[1]
    TM = _pick_tile(M, _TM_CAND)
    TN = _pick_tile(N, _TN_CAND)
    return pl.pallas_call(
        functools.partial(_ln_mm_kernel, gelu=gelu),
        grid=(M // TM, N // TN),
        in_specs=[
            pl.BlockSpec((TM, K), lambda i, j: (i, 0)),
            pl.BlockSpec((1, K), lambda i, j: (0, 0)),
            pl.BlockSpec((1, K), lambda i, j: (0, 0)),
            pl.BlockSpec((K, TN), lambda i, j: (0, j)),
            pl.BlockSpec((1, TN), lambda i, j: (0, j)),
        ],
        out_specs=pl.BlockSpec((TM, TN), lambda i, j: (i, j)),
        out_shape=jax.ShapeDtypeStruct((M, N), out_dtype),
        compiler_params=pltpu.CompilerParams(
            dimension_semantics=("parallel", "parallel")),
    )(x, g, beta, w, b)


def matmul_bias_res(x, w, b, r, out_dtype=jnp.bfloat16):
    M, K = x.shape
    N = w.shape[1]
    TM = _pick_tile(M, _TM_CAND)
    TN = _pick_tile(N, _TN_CAND)
    TK = _pick_tile(K, _TK_CAND)
    nk = K // TK
    return pl.pallas_call(
        functools.partial(_mm_bias_res_kernel, n_k=nk),
        grid=(M // TM, N // TN, nk),
        in_specs=[
            pl.BlockSpec((TM, TK), lambda i, j, k: (i, k)),
            pl.BlockSpec((TK, TN), lambda i, j, k: (k, j)),
            pl.BlockSpec((1, TN), lambda i, j, k: (0, j)),
            pl.BlockSpec((TM, TN), lambda i, j, k: (i, j)),
        ],
        out_specs=pl.BlockSpec((TM, TN), lambda i, j, k: (i, j)),
        out_shape=jax.ShapeDtypeStruct((M, N), out_dtype),
        scratch_shapes=[pltpu.VMEM((TM, TN), jnp.float32)],
        compiler_params=pltpu.CompilerParams(
            dimension_semantics=("parallel", "parallel", "arbitrary")),
    )(x, w, b, r)


def attention_proj(qkv, proj_w, proj_b, x_res, *, n_heads,
                   out_dtype=jnp.bfloat16):
    B, S, D3 = qkv.shape
    D = D3 // 3
    hd = D // n_heads
    scale = float(hd) ** -0.5

    def qkv_spec(off):
        return pl.BlockSpec((1, S, D), lambda b, o=off: (b, 0, o))

    return pl.pallas_call(
        functools.partial(_attn_proj_kernel, n_heads=n_heads, scale=scale),
        grid=(B,),
        in_specs=[
            qkv_spec(0), qkv_spec(1), qkv_spec(2),          # q, k, v windows
            pl.BlockSpec((D, D), lambda b: (0, 0)),          # proj_w
            pl.BlockSpec((1, D), lambda b: (0, 0)),          # proj_b
            pl.BlockSpec((1, S, D), lambda b: (b, 0, 0)),    # residual
        ],
        out_specs=pl.BlockSpec((1, S, D), lambda b: (b, 0, 0)),
        out_shape=jax.ShapeDtypeStruct((B, S, D), out_dtype),
        compiler_params=pltpu.CompilerParams(
            dimension_semantics=("parallel",)),
    )(qkv, qkv, qkv, proj_w, proj_b, x_res)


# ----------------------------- model ------------------------------------------

def init_params(key, *, channels, patch_size, d_model, d_ff, n_layers,
                n_heads, n_cls, num_patches):
    del n_heads
    keys = jax.random.split(key, 4 + n_layers)

    def nrm_bf16(k, shape):
        return (0.02 * jax.random.normal(k, shape)).astype(jnp.bfloat16)

    def nrm_f32(k, shape):
        return (0.02 * jax.random.normal(k, shape)).astype(jnp.float32)

    cpp = channels * patch_size * patch_size
    params = {
        "patch_w": nrm_bf16(keys[0], (cpp, d_model)),      # conv weight reshaped
        "patch_b": jnp.zeros((1, d_model), jnp.float32),
        "cls_token": nrm_f32(keys[1], (1, 1, d_model)),
        "pos_embed": nrm_f32(keys[2], (1, num_patches + 1, d_model)),
        "norm_g": jnp.ones((1, d_model), jnp.float32),
        "norm_b": jnp.zeros((1, d_model), jnp.float32),
        "head_w": nrm_bf16(keys[3], (d_model, n_cls)),
        "head_b": jnp.zeros((1, n_cls), jnp.float32),
        "blocks": [],
    }
    for i in range(n_layers):
        bk = jax.random.split(keys[4 + i], 4)
        params["blocks"].append({
            "ln1_g": jnp.ones((1, d_model), jnp.float32),
            "ln1_b": jnp.zeros((1, d_model), jnp.float32),
            "qkv_w": nrm_bf16(bk[0], (d_model, 3 * d_model)),
            "qkv_b": jnp.zeros((1, 3 * d_model), jnp.float32),
            "proj_w": nrm_bf16(bk[1], (d_model, d_model)),
            "proj_b": jnp.zeros((1, d_model), jnp.float32),
            "ln2_g": jnp.ones((1, d_model), jnp.float32),
            "ln2_b": jnp.zeros((1, d_model), jnp.float32),
            "fc1_w": nrm_bf16(bk[2], (d_model, d_ff)),
            "fc1_b": jnp.zeros((1, d_ff), jnp.float32),
            "fc2_w": nrm_bf16(bk[3], (d_ff, d_model)),
            "fc2_b": jnp.zeros((1, d_model), jnp.float32),
        })
    return params


def vit_forward(im, params, *, patch_size, n_heads):
    B, C, H, W = im.shape
    P = patch_size
    Hp, Wp = H // P, W // P
    N = Hp * Wp
    S = N + 1
    D = params["cls_token"].shape[-1]

    # --- patch gather (layout only) with a leading zero row for the cls slot --
    patches = (im.reshape(B, C, Hp, P, Wp, P)
                 .transpose(0, 2, 4, 1, 3, 5)            # (B, Hp, Wp, C, P, P)
                 .reshape(B, N, C * P * P)
                 .astype(jnp.bfloat16))
    patches = jnp.pad(patches, ((0, 0), (1, 0), (0, 0)))  # (B, S, Cpp)

    # additive table: row 0 = cls + pos[0]; rows 1.. = patch_bias + pos[1:]
    addin = jnp.concatenate(
        [params["cls_token"][0] + params["pos_embed"][0, :1],
         params["pos_embed"][0, 1:] + params["patch_b"]], axis=0)  # (S, D) f32

    # fused patch-embed matmul + cls token + positional embedding
    x = patch_embed(patches, params["patch_w"], addin)    # (B, S, D) bf16
    x = x.reshape(B * S, D)                               # dropout == identity

    for blk in params["blocks"]:
        # attention branch: LN+qkv, then fused attention + out-proj + residual
        qkv = ln_matmul_bias(x, blk["ln1_g"], blk["ln1_b"],
                             blk["qkv_w"], blk["qkv_b"], gelu=False)
        x = attention_proj(qkv.reshape(B, S, 3 * D),
                           blk["proj_w"], blk["proj_b"],
                           x.reshape(B, S, D), n_heads=n_heads)
        x = x.reshape(B * S, D)

        # MLP branch: LN+fc1+GELU, then K-tiled fc2 + bias + residual
        h = ln_matmul_bias(x, blk["ln2_g"], blk["ln2_b"],
                           blk["fc1_w"], blk["fc1_b"], gelu=True)
        x = matmul_bias_res(h, blk["fc2_w"], blk["fc2_b"], x)

    # --- classification head: slice cls token, then fused LN + head matmul ---
    # (LayerNorm is per-token, so slicing before the final norm is exact for
    # the logits path; return_features would need the full normalized x.)
    cls_feat = x.reshape(B, S, D)[:, 0]                   # (B, D) bf16
    logits = ln_matmul_bias(cls_feat, params["norm_g"], params["norm_b"],
                            params["head_w"], params["head_b"],
                            gelu=False, out_dtype=jnp.float32)
    return logits                                         # (B, n_cls) f32


# ----------------------------- main --------------------------------------------

if __name__ == "__main__":
    B, C = 2, 3
    image_size = 32
    patch_size = 8
    d_model, d_ff = 128, 256
    n_layers, n_heads, n_cls = 2, 4, 10
    num_patches = (image_size // patch_size) ** 2

    key = jax.random.PRNGKey(0)
    k_img, k_par = jax.random.split(key)
    im = jax.random.normal(k_img, (B, C, image_size, image_size), jnp.float32)

    params = init_params(k_par, channels=C, patch_size=patch_size,
                         d_model=d_model, d_ff=d_ff, n_layers=n_layers,
                         n_heads=n_heads, n_cls=n_cls, num_patches=num_patches)

    fwd = jax.jit(functools.partial(vit_forward, patch_size=patch_size,
                                    n_heads=n_heads))
    logits = fwd(im, params)
    logits = jax.block_until_ready(logits)
    assert logits.shape == (B, n_cls)
    assert bool(jnp.all(jnp.isfinite(logits)))
    print("KERNEL_OK")
</pallas_src>

<mosaic_0001>
module attributes {stable_mosaic.version = 11 : i64} {
  func.func @_patch_embed_kernel(%arg0: i32, %arg1: i32, %arg2: memref<1x17x192xbf16, #tpu.memory_space<vmem>>, %arg3: memref<192x128xbf16, #tpu.memory_space<vmem>>, %arg4: memref<17x128xf32, #tpu.memory_space<vmem>>, %arg5: memref<1x17x128xbf16, #tpu.memory_space<vmem>>) attributes {dimension_semantics = [#tpu.dimension_semantics<parallel>, #tpu.dimension_semantics<parallel>], iteration_bounds = array<i64: 2, 1>, scalar_prefetch = 0 : i64, scratch_operands = 0 : i64, tpu.core_type = #tpu.core_type<tc>, window_params = [{transform_indices = @transform_0, window_bounds = array<i64: 1, 17, 192>}, {transform_indices = @transform_1, window_bounds = array<i64: 192, 128>}, {transform_indices = @transform_2, window_bounds = array<i64: 17, 128>}, {transform_indices = @transform_3, window_bounds = array<i64: 1, 17, 128>}]} {
    %c0 = arith.constant 0 : index
    %c0_0 = arith.constant 0 : index
    %c0_1 = arith.constant 0 : index
    %0 = vector.load %arg2[%c0, %c0_0, %c0_1] : memref<1x17x192xbf16, #tpu.memory_space<vmem>>, vector<1x17x192xbf16>
    %1 = vector.shape_cast %0 : vector<1x17x192xbf16> to vector<17x192xbf16>
    %c0_2 = arith.constant 0 : index
    %c0_3 = arith.constant 0 : index
    %2 = vector.load %arg3[%c0_2, %c0_3] : memref<192x128xbf16, #tpu.memory_space<vmem>>, vector<192x128xbf16>
    %cst = arith.constant dense<0.000000e+00> : vector<17x128xf32>
    %3 = tpu.matmul %1, %2, %cst {dimension_numbers = #tpu.dot_dimension_numbers<[1], [0], [0], [1], [0, 0, 1, 1], [], []>} : vector<17x192xbf16>, vector<192x128xbf16>, vector<17x128xf32> -> vector<17x128xf32>
    %c0_4 = arith.constant 0 : index
    %c0_5 = arith.constant 0 : index
    %4 = vector.load %arg4[%c0_4, %c0_5] : memref<17x128xf32, #tpu.memory_space<vmem>>, vector<17x128xf32>
    %5 = arith.addf %3, %4 : vector<17x128xf32>
    %6 = arith.truncf %5 : vector<17x128xf32> to vector<17x128xbf16>
    %c0_6 = arith.constant 0 : index
    %c0_7 = arith.constant 0 : index
    %c0_8 = arith.constant 0 : index
    %7 = vector.load %arg5[%c0_6, %c0_7, %c0_8] : memref<1x17x128xbf16, #tpu.memory_space<vmem>>, vector<1x17x128xbf16>
    %8 = vector.shape_cast %7 : vector<1x17x128xbf16> to vector<17x128xbf16>
    %9 = vector.shape_cast %6 : vector<17x128xbf16> to vector<1x17x128xbf16>
    tpu.vector_store %arg5[%c0_6, %c0_7, %c0_8], %9 {strides = array<i32>} : memref<1x17x128xbf16, #tpu.memory_space<vmem>>, vector<1x17x128xbf16>,
    return
  }
  func.func @transform_0(%arg0: i32, %arg1: i32) -> (i32, i32, i32) {
    %c0_i32 = arith.constant 0 : i32
    %c0_i32_0 = arith.constant 0 : i32
    %c0_i32_1 = arith.constant 0 : i32
    return %arg0, %c0_i32, %c0_i32_0 : i32, i32, i32
  }
  func.func @transform_1(%arg0: i32, %arg1: i32) -> (i32, i32) {
    %c0_i32 = arith.constant 0 : i32
    %c0_i32_0 = arith.constant 0 : i32
    return %c0_i32, %arg1 : i32, i32
  }
  func.func @transform_2(%arg0: i32, %arg1: i32) -> (i32, i32) {
    %c0_i32 = arith.constant 0 : i32
    %c0_i32_0 = arith.constant 0 : i32
    return %c0_i32, %arg1 : i32, i32
  }
  func.func @transform_3(%arg0: i32, %arg1: i32) -> (i32, i32, i32) {
    %c0_i32 = arith.constant 0 : i32
    %c0_i32_0 = arith.constant 0 : i32
    return %arg0, %c0_i32, %arg1 : i32, i32, i32
  }
}

module attributes {stable_mosaic.version = 11 : i64} {
  func.func @_ln_mm_kernel(%arg0: i32, %arg1: i32, %arg2: memref<34x128xbf16, #tpu.memory_space<vmem>>, %arg3: memref<1x128xf32, #tpu.memory_space<vmem>>, %arg4: memref<1x128xf32, #tpu.memory_space<vmem>>, %arg5: memref<128x128xbf16, #tpu.memory_space<vmem>>, %arg6: memref<1x128xf32, #tpu.memory_space<vmem>>, %arg7: memref<34x128xbf16, #tpu.memory_space<vmem>>) attributes {dimension_semantics = [#tpu.dimension_semantics<parallel>, #tpu.dimension_semantics<parallel>], iteration_bounds = array<i64: 1, 3>, scalar_prefetch = 0 : i64, scratch_operands = 0 : i64, tpu.core_type = #tpu.core_type<tc>, window_params = [{transform_indices = @transform_0, window_bounds = array<i64: 34, 128>}, {pipeline_mode = #tpu.pipeline_mode<synchronous>, transform_indices = @transform_1, window_bounds = array<i64: 1, 128>}, {pipeline_mode = #tpu.pipeline_mode<synchronous>, transform_indices = @transform_2, window_bounds = array<i64: 1, 128>}, {transform_indices = @transform_3, window_bounds = array<i64: 128, 128>}, {transform_indices = @transform_4, window_bounds = array<i64: 1, 128>}, {transform_indices = @transform_5, window_bounds = array<i64: 34, 128>}]} {
    %c0 = arith.constant 0 : index
    %c0_0 = arith.constant 0 : index
    %0 = vector.load %arg2[%c0, %c0_0] : memref<34x128xbf16, #tpu.memory_space<vmem>>, vector<34x128xbf16>
    %1 = arith.extf %0 : vector<34x128xbf16> to vector<34x128xf32>
    %c0_1 = arith.constant 0 : index
    %c0_2 = arith.constant 0 : index
    %2 = vector.load %arg3[%c0_1, %c0_2] : memref<1x128xf32, #tpu.memory_space<vmem>>, vector<1x128xf32>
    %c0_3 = arith.constant 0 : index
    %c0_4 = arith.constant 0 : index
    %3 = vector.load %arg4[%c0_3, %c0_4] : memref<1x128xf32, #tpu.memory_space<vmem>>, vector<1x128xf32>
    %cst = arith.constant dense<0.000000e+00> : vector<34xf32>
    %4 = vector.multi_reduction <add>, %1, %cst [1] : vector<34x128xf32> to vector<34xf32>
    %5 = vector.shape_cast %4 : vector<34xf32> to vector<34x1xf32>
    %cst_5 = arith.constant 1.280000e+02 : f32
    %6 = vector.broadcast %cst_5 : f32 to vector<34x1xf32>
    %7 = arith.divf %5, %6 : vector<34x1xf32>
    %8 = vector.broadcast %7 : vector<34x1xf32> to vector<34x128xf32>
    %9 = arith.subf %1, %8 : vector<34x128xf32>
    %10 = arith.mulf %9, %9 : vector<34x128xf32>
    %cst_6 = arith.constant dense<0.000000e+00> : vector<34xf32>
    %11 = vector.multi_reduction <add>, %10, %cst_6 [1] : vector<34x128xf32> to vector<34xf32>
    %12 = vector.shape_cast %11 : vector<34xf32> to vector<34x1xf32>
    %cst_7 = arith.constant 1.280000e+02 : f32
    %13 = vector.broadcast %cst_7 : f32 to vector<34x1xf32>
    %14 = arith.divf %12, %13 : vector<34x1xf32>
    %15 = vector.broadcast %7 : vector<34x1xf32> to vector<34x128xf32>
    %16 = arith.subf %1, %15 : vector<34x128xf32>
    %cst_8 = arith.constant 9.99999974E-6 : f32
    %17 = vector.broadcast %cst_8 : f32 to vector<34x1xf32>
    %18 = arith.addf %14, %17 : vector<34x1xf32>
    %19 = math.rsqrt %18 : vector<34x1xf32>
    %20 = vector.broadcast %19 : vector<34x1xf32> to vector<34x128xf32>
    %21 = arith.mulf %16, %20 : vector<34x128xf32>
    %22 = vector.broadcast %2 : vector<1x128xf32> to vector<34x128xf32>
    %23 = arith.mulf %21, %22 : vector<34x128xf32>
    %24 = vector.broadcast %3 : vector<1x128xf32> to vector<34x128xf32>
    %25 = arith.addf %23, %24 : vector<34x128xf32>
    %26 = arith.truncf %25 : vector<34x128xf32> to vector<34x128xbf16>
    %c0_9 = arith.constant 0 : index
    %c0_10 = arith.constant 0 : index
    %27 = vector.load %arg5[%c0_9, %c0_10] : memref<128x128xbf16, #tpu.memory_space<vmem>>, vector<128x128xbf16>
    %cst_11 = arith.constant dense<0.000000e+00> : vector<34x128xf32>
    %28 = tpu.matmul %26, %27, %cst_11 {dimension_numbers = #tpu.dot_dimension_numbers<[1], [0], [0], [1], [0, 0, 1, 1], [], []>} : vector<34x128xbf16>, vector<128x128xbf16>, vector<34x128xf32> -> vector<34x128xf32>
    %c0_12 = arith.constant 0 : index
    %c0_13 = arith.constant 0 : index
    %29 = vector.load %arg6[%c0_12, %c0_13] : memref<1x128xf32, #tpu.memory_space<vmem>>, vector<1x128xf32>
    %30 = vector.broadcast %29 : vector<1x128xf32> to vector<34x128xf32>
    %31 = arith.addf %28, %30 : vector<34x128xf32>
    %32 = arith.truncf %31 : vector<34x128xf32> to vector<34x128xbf16>
    %c0_14 = arith.constant 0 : index
    %c0_15 = arith.constant 0 : index
    %33 = vector.load %arg7[%c0_14, %c0_15] : memref<34x128xbf16, #tpu.memory_space<vmem>>, vector<34x128xbf16>
    tpu.vector_store %arg7[%c0_14, %c0_15], %32 {strides = array<i32>} : memref<34x128xbf16, #tpu.memory_space<vmem>>, vector<34x128xbf16>,
    return
  }
  func.func @transform_0(%arg0: i32, %arg1: i32) -> (i32, i32) {
    %c0_i32 = arith.constant 0 : i32
    %c0_i32_0 = arith.constant 0 : i32
    return %arg0, %c0_i32 : i32, i32
  }
  func.func @transform_1(%arg0: i32, %arg1: i32) -> (i32, i32) {
    %c0_i32 = arith.constant 0 : i32
    %c0_i32_0 = arith.constant 0 : i32
    %c0_i32_1 = arith.constant 0 : i32
    return %c0_i32, %c0_i32_0 : i32, i32
  }
  func.func @transform_2(%arg0: i32, %arg1: i32) -> (i32, i32) {
    %c0_i32 = arith.constant 0 : i32
    %c0_i32_0 = arith.constant 0 : i32
    %c0_i32_1 = arith.constant 0 : i32
    return %c0_i32, %c0_i32_0 : i32, i32
  }
  func.func @transform_3(%arg0: i32, %arg1: i32) -> (i32, i32) {
    %c0_i32 = arith.constant 0 : i32
    %c0_i32_0 = arith.constant 0 : i32
    return %c0_i32, %arg1 : i32, i32
  }
  func.func @transform_4(%arg0: i32, %arg1: i32) -> (i32, i32) {
    %c0_i32 = arith.constant 0 : i32
    %c0_i32_0 = arith.constant 0 : i32
    return %c0_i32, %arg1 : i32, i32
  }
  func.func @transform_5(%arg0: i32, %arg1: i32) -> (i32, i32) {
    %c0_i32 = arith.constant 0 : i32
    return %arg0, %arg1 : i32, i32
  }
}

module attributes {stable_mosaic.version = 11 : i64} {
  func.func @_ln_mm_kernel(%arg0: i32, %arg1: i32, %arg2: memref<34x128xbf16, #tpu.memory_space<vmem>>, %arg3: memref<1x128xf32, #tpu.memory_space<vmem>>, %arg4: memref<1x128xf32, #tpu.memory_space<vmem>>, %arg5: memref<128x256xbf16, #tpu.memory_space<vmem>>, %arg6: memref<1x256xf32, #tpu.memory_space<vmem>>, %arg7: memref<34x256xbf16, #tpu.memory_space<vmem>>) attributes {dimension_semantics = [#tpu.dimension_semantics<parallel>, #tpu.dimension_semantics<parallel>], iteration_bounds = array<i64: 1, 1>, scalar_prefetch = 0 : i64, scratch_operands = 0 : i64, tpu.core_type = #tpu.core_type<tc>, window_params = [{transform_indices = @transform_0, window_bounds = array<i64: 34, 128>}, {pipeline_mode = #tpu.pipeline_mode<synchronous>, transform_indices = @transform_1, window_bounds = array<i64: 1, 128>}, {pipeline_mode = #tpu.pipeline_mode<synchronous>, transform_indices = @transform_2, window_bounds = array<i64: 1, 128>}, {transform_indices = @transform_3, window_bounds = array<i64: 128, 256>}, {transform_indices = @transform_4, window_bounds = array<i64: 1, 256>}, {transform_indices = @transform_5, window_bounds = array<i64: 34, 256>}]} {
    %c0 = arith.constant 0 : index
    %c0_0 = arith.constant 0 : index
    %0 = vector.load %arg2[%c0, %c0_0] : memref<34x128xbf16, #tpu.memory_space<vmem>>, vector<34x128xbf16>
    %1 = arith.extf %0 : vector<34x128xbf16> to vector<34x128xf32>
    %c0_1 = arith.constant 0 : index
    %c0_2 = arith.constant 0 : index
    %2 = vector.load %arg3[%c0_1, %c0_2] : memref<1x128xf32, #tpu.memory_space<vmem>>, vector<1x128xf32>
    %c0_3 = arith.constant 0 : index
    %c0_4 = arith.constant 0 : index
    %3 = vector.load %arg4[%c0_3, %c0_4] : memref<1x128xf32, #tpu.memory_space<vmem>>, vector<1x128xf32>
    %cst = arith.constant dense<0.000000e+00> : vector<34xf32>
    %4 = vector.multi_reduction <add>, %1, %cst [1] : vector<34x128xf32> to vector<34xf32>
    %5 = vector.shape_cast %4 : vector<34xf32> to vector<34x1xf32>
    %cst_5 = arith.constant 1.280000e+02 : f32
    %6 = vector.broadcast %cst_5 : f32 to vector<34x1xf32>
    %7 = arith.divf %5, %6 : vector<34x1xf32>
    %8 = vector.broadcast %7 : vector<34x1xf32> to vector<34x128xf32>
    %9 = arith.subf %1, %8 : vector<34x128xf32>
    %10 = arith.mulf %9, %9 : vector<34x128xf32>
    %cst_6 = arith.constant dense<0.000000e+00> : vector<34xf32>
    %11 = vector.multi_reduction <add>, %10, %cst_6 [1] : vector<34x128xf32> to vector<34xf32>
    %12 = vector.shape_cast %11 : vector<34xf32> to vector<34x1xf32>
    %cst_7 = arith.constant 1.280000e+02 : f32
    %13 = vector.broadcast %cst_7 : f32 to vector<34x1xf32>
    %14 = arith.divf %12, %13 : vector<34x1xf32>
    %15 = vector.broadcast %7 : vector<34x1xf32> to vector<34x128xf32>
    %16 = arith.subf %1, %15 : vector<34x128xf32>
    %cst_8 = arith.constant 9.99999974E-6 : f32
    %17 = vector.broadcast %cst_8 : f32 to vector<34x1xf32>
    %18 = arith.addf %14, %17 : vector<34x1xf32>
    %19 = math.rsqrt %18 : vector<34x1xf32>
    %20 = vector.broadcast %19 : vector<34x1xf32> to vector<34x128xf32>
    %21 = arith.mulf %16, %20 : vector<34x128xf32>
    %22 = vector.broadcast %2 : vector<1x128xf32> to vector<34x128xf32>
    %23 = arith.mulf %21, %22 : vector<34x128xf32>
    %24 = vector.broadcast %3 : vector<1x128xf32> to vector<34x128xf32>
    %25 = arith.addf %23, %24 : vector<34x128xf32>
    %26 = arith.truncf %25 : vector<34x128xf32> to vector<34x128xbf16>
    %c0_9 = arith.constant 0 : index
    %c0_10 = arith.constant 0 : index
    %27 = vector.load %arg5[%c0_9, %c0_10] : memref<128x256xbf16, #tpu.memory_space<vmem>>, vector<128x256xbf16>
    %cst_11 = arith.constant dense<0.000000e+00> : vector<34x256xf32>
    %28 = tpu.matmul %26, %27, %cst_11 {dimension_numbers = #tpu.dot_dimension_numbers<[1], [0], [0], [1], [0, 0, 1, 1], [], []>} : vector<34x128xbf16>, vector<128x256xbf16>, vector<34x256xf32> -> vector<34x256xf32>
    %c0_12 = arith.constant 0 : index
    %c0_13 = arith.constant 0 : index
    %29 = vector.load %arg6[%c0_12, %c0_13] : memref<1x256xf32, #tpu.memory_space<vmem>>, vector<1x256xf32>
    %30 = vector.broadcast %29 : vector<1x256xf32> to vector<34x256xf32>
    %31 = arith.addf %28, %30 : vector<34x256xf32>
    %32 = arith.mulf %31, %31 : vector<34x256xf32>
    %33 = arith.mulf %31, %32 : vector<34x256xf32>
    %cst_14 = arith.constant 4.471500e-02 : f32
    %34 = vector.broadcast %cst_14 : f32 to vector<34x256xf32>
    %35 = arith.mulf %34, %33 : vector<34x256xf32>
    %36 = arith.addf %31, %35 : vector<34x256xf32>
    %cst_15 = arith.constant 0.797884583 : f32
    %37 = vector.broadcast %cst_15 : f32 to vector<34x256xf32>
    %38 = arith.mulf %37, %36 : vector<34x256xf32>
    %39 = math.tanh %38 : vector<34x256xf32>
    %cst_16 = arith.constant 1.000000e+00 : f32
    %40 = vector.broadcast %cst_16 : f32 to vector<34x256xf32>
    %41 = arith.addf %40, %39 : vector<34x256xf32>
    %cst_17 = arith.constant 5.000000e-01 : f32
    %42 = vector.broadcast %cst_17 : f32 to vector<34x256xf32>
    %43 = arith.mulf %42, %41 : vector<34x256xf32>
    %44 = arith.mulf %31, %43 : vector<34x256xf32>
    %45 = arith.truncf %44 : vector<34x256xf32> to vector<34x256xbf16>
    %c0_18 = arith.constant 0 : index
    %c0_19 = arith.constant 0 : index
    %46 = vector.load %arg7[%c0_18, %c0_19] : memref<34x256xbf16, #tpu.memory_space<vmem>>, vector<34x256xbf16>
    tpu.vector_store %arg7[%c0_18, %c0_19], %45 {strides = array<i32>} : memref<34x256xbf16, #tpu.memory_space<vmem>>, vector<34x256xbf16>,
    return
  }
  func.func @transform_0(%arg0: i32, %arg1: i32) -> (i32, i32) {
    %c0_i32 = arith.constant 0 : i32
    %c0_i32_0 = arith.constant 0 : i32
    return %arg0, %c0_i32 : i32, i32
  }
  func.func @transform_1(%arg0: i32, %arg1: i32) -> (i32, i32) {
    %c0_i32 = arith.constant 0 : i32
    %c0_i32_0 = arith.constant 0 : i32
    %c0_i32_1 = arith.constant 0 : i32
    return %c0_i32, %c0_i32_0 : i32, i32
  }
  func.func @transform_2(%arg0: i32, %arg1: i32) -> (i32, i32) {
    %c0_i32 = arith.constant 0 : i32
    %c0_i32_0 = arith.constant 0 : i32
    %c0_i32_1 = arith.constant 0 : i32
    return %c0_i32, %c0_i32_0 : i32, i32
  }
  func.func @transform_3(%arg0: i32, %arg1: i32) -> (i32, i32) {
    %c0_i32 = arith.constant 0 : i32
    %c0_i32_0 = arith.constant 0 : i32
    return %c0_i32, %arg1 : i32, i32
  }
  func.func @transform_4(%arg0: i32, %arg1: i32) -> (i32, i32) {
    %c0_i32 = arith.constant 0 : i32
    %c0_i32_0 = arith.constant 0 : i32
    return %c0_i32, %arg1 : i32, i32
  }
  func.func @transform_5(%arg0: i32, %arg1: i32) -> (i32, i32) {
    %c0_i32 = arith.constant 0 : i32
    return %arg0, %arg1 : i32, i32
  }
}

module attributes {stable_mosaic.version = 11 : i64} {
  func.func @_attn_proj_kernel(%arg0: i32, %arg1: memref<1x17x128xbf16, #tpu.memory_space<vmem>>, %arg2: memref<1x17x128xbf16, #tpu.memory_space<vmem>>, %arg3: memref<1x17x128xbf16, #tpu.memory_space<vmem>>, %arg4: memref<128x128xbf16, #tpu.memory_space<vmem>>, %arg5: memref<1x128xf32, #tpu.memory_space<vmem>>, %arg6: memref<1x17x128xbf16, #tpu.memory_space<vmem>>, %arg7: memref<1x17x128xbf16, #tpu.memory_space<vmem>>) attributes {dimension_semantics = [#tpu.dimension_semantics<parallel>], iteration_bounds = array<i64: 2>, scalar_prefetch = 0 : i64, scratch_operands = 0 : i64, tpu.core_type = #tpu.core_type<tc>, window_params = [{transform_indices = @transform_0, window_bounds = array<i64: 1, 17, 128>}, {transform_indices = @transform_1, window_bounds = array<i64: 1, 17, 128>}, {transform_indices = @transform_2, window_bounds = array<i64: 1, 17, 128>}, {pipeline_mode = #tpu.pipeline_mode<synchronous>, transform_indices = @transform_3, window_bounds = array<i64: 128, 128>}, {pipeline_mode = #tpu.pipeline_mode<synchronous>, transform_indices = @transform_4, window_bounds = array<i64: 1, 128>}, {transform_indices = @transform_5, window_bounds = array<i64: 1, 17, 128>}, {transform_indices = @transform_6, window_bounds = array<i64: 1, 17, 128>}]} {
    %c0 = arith.constant 0 : index
    %c0_0 = arith.constant 0 : index
    %c0_1 = arith.constant 0 : index
    %0 = vector.load %arg6[%c0, %c0_0, %c0_1] : memref<1x17x128xbf16, #tpu.memory_space<vmem>>, vector<1x17x128xbf16>
    %1 = vector.shape_cast %0 : vector<1x17x128xbf16> to vector<17x128xbf16>
    %2 = arith.extf %1 : vector<17x128xbf16> to vector<17x128xf32>
    %c0_2 = arith.constant 0 : index
    %c0_3 = arith.constant 0 : index
    %3 = vector.load %arg5[%c0_2, %c0_3] : memref<1x128xf32, #tpu.memory_space<vmem>>, vector<1x128xf32>
    %4 = vector.broadcast %3 : vector<1x128xf32> to vector<17x128xf32>
    %5 = arith.addf %2, %4 : vector<17x128xf32>
    %c0_4 = arith.constant 0 : index
    %c0_5 = arith.constant 0 : index
    %c0_6 = arith.constant 0 : index
    %6 = vector.load %arg1[%c0_4, %c0_5, %c0_6] : memref<1x17x128xbf16, #tpu.memory_space<vmem>>, vector<1x17x32xbf16>
    %7 = vector.shape_cast %6 : vector<1x17x32xbf16> to vector<17x32xbf16>
    %c0_7 = arith.constant 0 : index
    %c0_8 = arith.constant 0 : index
    %c0_9 = arith.constant 0 : index
    %8 = vector.load %arg2[%c0_7, %c0_8, %c0_9] : memref<1x17x128xbf16, #tpu.memory_space<vmem>>, vector<1x17x32xbf16>
    %9 = vector.shape_cast %8 : vector<1x17x32xbf16> to vector<17x32xbf16>
    %c0_10 = arith.constant 0 : index
    %c0_11 = arith.constant 0 : index
    %c0_12 = arith.constant 0 : index
    %10 = vector.load %arg3[%c0_10, %c0_11, %c0_12] : memref<1x17x128xbf16, #tpu.memory_space<vmem>>, vector<1x17x32xbf16>
    %11 = vector.shape_cast %10 : vector<1x17x32xbf16> to vector<17x32xbf16>
    %cst = arith.constant dense<0.000000e+00> : vector<17x17xf32>
    %12 = tpu.matmul %7, %9, %cst {dimension_numbers = #tpu.dot_dimension_numbers<[1], [1], [0], [0], [0, 0, 1, 0], [], []>} : vector<17x32xbf16>, vector<17x32xbf16>, vector<17x17xf32> -> vector<17x17xf32>
    %cst_13 = arith.constant 0.176776692 : f32
    %13 = vector.broadcast %cst_13 : f32 to vector<17x17xf32>
    %14 = arith.mulf %12, %13 : vector<17x17xf32>
    %cst_14 = arith.constant dense<0xFF800000> : vector<17xf32>
    %15 = vector.multi_reduction <maximumf>, %14, %cst_14 [1] : vector<17x17xf32> to vector<17xf32>
    %16 = vector.shape_cast %15 : vector<17xf32> to vector<17x1xf32>
    %17 = vector.broadcast %16 : vector<17x1xf32> to vector<17x17xf32>
    %18 = arith.subf %14, %17 : vector<17x17xf32>
    %19 = math.exp %18 : vector<17x17xf32>
    %cst_15 = arith.constant dense<0.000000e+00> : vector<17xf32>
    %20 = vector.multi_reduction <add>, %19, %cst_15 [1] : vector<17x17xf32> to vector<17xf32>
    %21 = vector.shape_cast %20 : vector<17xf32> to vector<17x1xf32>
    %22 = tpu.reciprocal %21 {approx = true} : vector<17x1xf32> -> vector<17x1xf32>
    %23 = vector.broadcast %22 : vector<17x1xf32> to vector<17x17xf32>
    %24 = arith.mulf %19, %23 : vector<17x17xf32>
    %25 = arith.truncf %24 : vector<17x17xf32> to vector<17x17xbf16>
    %cst_16 = arith.constant dense<0.000000e+00> : vector<17x32xf32>
    %26 = tpu.matmul %25, %11, %cst_16 {dimension_numbers = #tpu.dot_dimension_numbers<[1], [0], [0], [1], [0, 0, 1, 1], [], []>} : vector<17x17xbf16>, vector<17x32xbf16>, vector<17x32xf32> -> vector<17x32xf32>
    %27 = arith.truncf %26 : vector<17x32xf32> to vector<17x32xbf16>
    %c0_17 = arith.constant 0 : index
    %c0_18 = arith.constant 0 : index
    %28 = vector.load %arg4[%c0_17, %c0_18] : memref<128x128xbf16, #tpu.memory_space<vmem>>, vector<32x128xbf16>
    %cst_19 = arith.constant dense<0.000000e+00> : vector<17x128xf32>
    %29 = tpu.matmul %27, %28, %cst_19 {dimension_numbers = #tpu.dot_dimension_numbers<[1], [0], [0], [1], [0, 0, 1, 1], [], []>} : vector<17x32xbf16>, vector<32x128xbf16>, vector<17x128xf32> -> vector<17x128xf32>
    %30 = arith.addf %5, %29 : vector<17x128xf32>
    %c0_20 = arith.constant 0 : index
    %c0_21 = arith.constant 0 : index
    %c32 = arith.constant 32 : index
    %31 = vector.load %arg1[%c0_20, %c0_21, %c32] : memref<1x17x128xbf16, #tpu.memory_space<vmem>>, vector<1x17x32xbf16>
    %32 = vector.shape_cast %31 : vector<1x17x32xbf16> to vector<17x32xbf16>
    %c0_22 = arith.constant 0 : index
    %c0_23 = arith.constant 0 : index
    %c32_24 = arith.constant 32 : index
    %33 = vector.load %arg2[%c0_22, %c0_23, %c32_24] : memref<1x17x128xbf16, #tpu.memory_space<vmem>>, vector<1x17x32xbf16>
    %34 = vector.shape_cast %33 : vector<1x17x32xbf16> to vector<17x32xbf16>
    %c0_25 = arith.constant 0 : index
    %c0_26 = arith.constant 0 : index
    %c32_27 = arith.constant 32 : index
    %35 = vector.load %arg3[%c0_25, %c0_26, %c32_27] : memref<1x17x128xbf16, #tpu.memory_space<vmem>>, vector<1x17x32xbf16>
    %36 = vector.shape_cast %35 : vector<1x17x32xbf16> to vector<17x32xbf16>
    %cst_28 = arith.constant dense<0.000000e+00> : vector<17x17xf32>
    %37 = tpu.matmul %32, %34, %cst_28 {dimension_numbers = #tpu.dot_dimension_numbers<[1], [1], [0], [0], [0, 0, 1, 0], [], []>} : vector<17x32xbf16>, vector<17x32xbf16>, vector<17x17xf32> -> vector<17x17xf32>
    %cst_29 = arith.constant 0.176776692 : f32
    %38 = vector.broadcast %cst_29 : f32 to vector<17x17xf32>
    %39 = arith.mulf %37, %38 : vector<17x17xf32>
    %cst_30 = arith.constant dense<0xFF800000> : vector<17xf32>
    %40 = vector.multi_reduction <maximumf>, %39, %cst_30 [1] : vector<17x17xf32> to vector<17xf32>
    %41 = vector.shape_cast %40 : vector<17xf32> to vector<17x1xf32>
    %42 = vector.broadcast %41 : vector<17x1xf32> to vector<17x17xf32>
    %43 = arith.subf %39, %42 : vector<17x17xf32>
    %44 = math.exp %43 : vector<17x17xf32>
    %cst_31 = arith.constant dense<0.000000e+00> : vector<17xf32>
    %45 = vector.multi_reduction <add>, %44, %cst_31 [1] : vector<17x17xf32> to vector<17xf32>
    %46 = vector.shape_cast %45 : vector<17xf32> to vector<17x1xf32>
    %47 = tpu.reciprocal %46 {approx = true} : vector<17x1xf32> -> vector<17x1xf32>
    %48 = vector.broadcast %47 : vector<17x1xf32> to vector<17x17xf32>
    %49 = arith.mulf %44, %48 : vector<17x17xf32>
    %50 = arith.truncf %49 : vector<17x17xf32> to vector<17x17xbf16>
    %cst_32 = arith.constant dense<0.000000e+00> : vector<17x32xf32>
    %51 = tpu.matmul %50, %36, %cst_32 {dimension_numbers = #tpu.dot_dimension_numbers<[1], [0], [0], [1], [0, 0, 1, 1], [], []>} : vector<17x17xbf16>, vector<17x32xbf16>, vector<17x32xf32> -> vector<17x32xf32>
    %52 = arith.truncf %51 : vector<17x32xf32> to vector<17x32xbf16>
    %c32_33 = arith.constant 32 : index
    %c0_34 = arith.constant 0 : index
    %53 = vector.load %arg4[%c32_33, %c0_34] : memref<128x128xbf16, #tpu.memory_space<vmem>>, vector<32x128xbf16>
    %cst_35 = arith.constant dense<0.000000e+00> : vector<17x128xf32>
    %54 = tpu.matmul %52, %53, %cst_35 {dimension_numbers = #tpu.dot_dimension_numbers<[1], [0], [0], [1], [0, 0, 1, 1], [], []>} : vector<17x32xbf16>, vector<32x128xbf16>, vector<17x128xf32> -> vector<17x128xf32>
    %55 = arith.addf %30, %54 : vector<17x128xf32>
    %c0_36 = arith.constant 0 : index
    %c0_37 = arith.constant 0 : index
    %c64 = arith.constant 64 : index
    %56 = vector.load %arg1[%c0_36, %c0_37, %c64] : memref<1x17x128xbf16, #tpu.memory_space<vmem>>, vector<1x17x32xbf16>
    %57 = vector.shape_cast %56 : vector<1x17x32xbf16> to vector<17x32xbf16>
    %c0_38 = arith.constant 0 : index
    %c0_39 = arith.constant 0 : index
    %c64_40 = arith.constant 64 : index
    %58 = vector.load %arg2[%c0_38, %c0_39, %c64_40] : memref<1x17x128xbf16, #tpu.memory_space<vmem>>, vector<1x17x32xbf16>
    %59 = vector.shape_cast %58 : vector<1x17x32xbf16> to vector<17x32xbf16>
    %c0_41 = arith.constant 0 : index
    %c0_42 = arith.constant 0 : index
    %c64_43 = arith.constant 64 : index
    %60 = vector.load %arg3[%c0_41, %c0_42, %c64_43] : memref<1x17x128xbf16, #tpu.memory_space<vmem>>, vector<1x17x32xbf16>
    %61 = vector.shape_cast %60 : vector<1x17x32xbf16> to vector<17x32xbf16>
    %cst_44 = arith.constant dense<0.000000e+00> : vector<17x17xf32>
    %62 = tpu.matmul %57, %59, %cst_44 {dimension_numbers = #tpu.dot_dimension_numbers<[1], [1], [0], [0], [0, 0, 1, 0], [], []>} : vector<17x32xbf16>, vector<17x32xbf16>, vector<17x17xf32> -> vector<17x17xf32>
    %cst_45 = arith.constant 0.176776692 : f32
    %63 = vector.broadcast %cst_45 : f32 to vector<17x17xf32>
    %64 = arith.mulf %62, %63 : vector<17x17xf32>
    %cst_46 = arith.constant dense<0xFF800000> : vector<17xf32>
    %65 = vector.multi_reduction <maximumf>, %64, %cst_46 [1] : vector<17x17xf32> to vector<17xf32>
    %66 = vector.shape_cast %65 : vector<17xf32> to vector<17x1xf32>
    %67 = vector.broadcast %66 : vector<17x1xf32> to vector<17x17xf32>
    %68 = arith.subf %64, %67 : vector<17x17xf32>
    %69 = math.exp %68 : vector<17x17xf32>
    %cst_47 = arith.constant dense<0.000000e+00> : vector<17xf32>
    %70 = vector.multi_reduction <add>, %69, %cst_47 [1] : vector<17x17xf32> to vector<17xf32>
    %71 = vector.shape_cast %70 : vector<17xf32> to vector<17x1xf32>
    %72 = tpu.reciprocal %71 {approx = true} : vector<17x1xf32> -> vector<17x1xf32>
    %73 = vector.broadcast %72 : vector<17x1xf32> to vector<17x17xf32>
    %74 = arith.mulf %69, %73 : vector<17x17xf32>
    %75 = arith.truncf %74 : vector<17x17xf32> to vector<17x17xbf16>
    %cst_48 = arith.constant dense<0.000000e+00> : vector<17x32xf32>
    %76 = tpu.matmul %75, %61, %cst_48 {dimension_numbers = #tpu.dot_dimension_numbers<[1], [0], [0], [1], [0, 0, 1, 1], [], []>} : vector<17x17xbf16>, vector<17x32xbf16>, vector<17x32xf32> -> vector<17x32xf32>
    %77 = arith.truncf %76 : vector<17x32xf32> to vector<17x32xbf16>
    %c64_49 = arith.constant 64 : index
    %c0_50 = arith.constant 0 : index
    %78 = vector.load %arg4[%c64_49, %c0_50] : memref<128x128xbf16, #tpu.memory_space<vmem>>, vector<32x128xbf16>
    %cst_51 = arith.constant dense<0.000000e+00> : vector<17x128xf32>
    %79 = tpu.matmul %77, %78, %cst_51 {dimension_numbers = #tpu.dot_dimension_numbers<[1], [0], [0], [1], [0, 0, 1, 1], [], []>} : vector<17x32xbf16>, vector<32x128xbf16>, vector<17x128xf32> -> vector<17x128xf32>
    %80 = arith.addf %55, %79 : vector<17x128xf32>
    %c0_52 = arith.constant 0 : index
    %c0_53 = arith.constant 0 : index
    %c96 = arith.constant 96 : index
    %81 = vector.load %arg1[%c0_52, %c0_53, %c96] : memref<1x17x128xbf16, #tpu.memory_space<vmem>>, vector<1x17x32xbf16>
    %82 = vector.shape_cast %81 : vector<1x17x32xbf16> to vector<17x32xbf16>
    %c0_54 = arith.constant 0 : index
    %c0_55 = arith.constant 0 : index
    %c96_56 = arith.constant 96 : index
    %83 = vector.load %arg2[%c0_54, %c0_55, %c96_56] : memref<1x17x128xbf16, #tpu.memory_space<vmem>>, vector<1x17x32xbf16>
    %84 = vector.shape_cast %83 : vector<1x17x32xbf16> to vector<17x32xbf16>
    %c0_57 = arith.constant 0 : index
    %c0_58 = arith.constant 0 : index
    %c96_59 = arith.constant 96 : index
    %85 = vector.load %arg3[%c0_57, %c0_58, %c96_59] : memref<1x17x128xbf16, #tpu.memory_space<vmem>>, vector<1x17x32xbf16>
    %86 = vector.shape_cast %85 : vector<1x17x32xbf16> to vector<17x32xbf16>
    %cst_60 = arith.constant dense<0.000000e+00> : vector<17x17xf32>
    %87 = tpu.matmul %82, %84, %cst_60 {dimension_numbers = #tpu.dot_dimension_numbers<[1], [1], [0], [0], [0, 0, 1, 0], [], []>} : vector<17x32xbf16>, vector<17x32xbf16>, vector<17x17xf32> -> vector<17x17xf32>
    %cst_61 = arith.constant 0.176776692 : f32
    %88 = vector.broadcast %cst_61 : f32 to vector<17x17xf32>
    %89 = arith.mulf %87, %88 : vector<17x17xf32>
    %cst_62 = arith.constant dense<0xFF800000> : vector<17xf32>
    %90 = vector.multi_reduction <maximumf>, %89, %cst_62 [1] : vector<17x17xf32> to vector<17xf32>
    %91 = vector.shape_cast %90 : vector<17xf32> to vector<17x1xf32>
    %92 = vector.broadcast %91 : vector<17x1xf32> to vector<17x17xf32>
    %93 = arith.subf %89, %92 : vector<17x17xf32>
    %94 = math.exp %93 : vector<17x17xf32>
    %cst_63 = arith.constant dense<0.000000e+00> : vector<17xf32>
    %95 = vector.multi_reduction <add>, %94, %cst_63 [1] : vector<17x17xf32> to vector<17xf32>
    %96 = vector.shape_cast %95 : vector<17xf32> to vector<17x1xf32>
    %97 = tpu.reciprocal %96 {approx = true} : vector<17x1xf32> -> vector<17x1xf32>
    %98 = vector.broadcast %97 : vector<17x1xf32> to vector<17x17xf32>
    %99 = arith.mulf %94, %98 : vector<17x17xf32>
    %100 = arith.truncf %99 : vector<17x17xf32> to vector<17x17xbf16>
    %cst_64 = arith.constant dense<0.000000e+00> : vector<17x32xf32>
    %101 = tpu.matmul %100, %86, %cst_64 {dimension_numbers = #tpu.dot_dimension_numbers<[1], [0], [0], [1], [0, 0, 1, 1], [], []>} : vector<17x17xbf16>, vector<17x32xbf16>, vector<17x32xf32> -> vector<17x32xf32>
    %102 = arith.truncf %101 : vector<17x32xf32> to vector<17x32xbf16>
    %c96_65 = arith.constant 96 : index
    %c0_66 = arith.constant 0 : index
    %103 = vector.load %arg4[%c96_65, %c0_66] : memref<128x128xbf16, #tpu.memory_space<vmem>>, vector<32x128xbf16>
    %cst_67 = arith.constant dense<0.000000e+00> : vector<17x128xf32>
    %104 = tpu.matmul %102, %103, %cst_67 {dimension_numbers = #tpu.dot_dimension_numbers<[1], [0], [0], [1], [0, 0, 1, 1], [], []>} : vector<17x32xbf16>, vector<32x128xbf16>, vector<17x128xf32> -> vector<17x128xf32>
    %105 = arith.addf %80, %104 : vector<17x128xf32>
    %106 = arith.truncf %105 : vector<17x128xf32> to vector<17x128xbf16>
    %c0_68 = arith.constant 0 : index
    %c0_69 = arith.constant 0 : index
    %c0_70 = arith.constant 0 : index
    %107 = vector.load %arg7[%c0_68, %c0_69, %c0_70] : memref<1x17x128xbf16, #tpu.memory_space<vmem>>, vector<1x17x128xbf16>
    %108 = vector.shape_cast %107 : vector<1x17x128xbf16> to vector<17x128xbf16>
    %109 = vector.shape_cast %106 : vector<17x128xbf16> to vector<1x17x128xbf16>
    tpu.vector_store %arg7[%c0_68, %c0_69, %c0_70], %109 {strides = array<i32>} : memref<1x17x128xbf16, #tpu.memory_space<vmem>>, vector<1x17x128xbf16>,
    return
  }
  func.func @transform_0(%arg0: i32) -> (i32, i32, i32) {
    %c0_i32 = arith.constant 0 : i32
    %c0_i32_0 = arith.constant 0 : i32
    %c0_i32_1 = arith.constant 0 : i32
    return %arg0, %c0_i32, %c0_i32_0 : i32, i32, i32
  }
  func.func @transform_1(%arg0: i32) -> (i32, i32, i32) {
    %c0_i32 = arith.constant 0 : i32
    %c1_i32 = arith.constant 1 : i32
    %c0_i32_0 = arith.constant 0 : i32
    return %arg0, %c0_i32, %c1_i32 : i32, i32, i32
  }
  func.func @transform_2(%arg0: i32) -> (i32, i32, i32) {
    %c0_i32 = arith.constant 0 : i32
    %c2_i32 = arith.constant 2 : i32
    %c0_i32_0 = arith.constant 0 : i32
    return %arg0, %c0_i32, %c2_i32 : i32, i32, i32
  }
  func.func @transform_3(%arg0: i32) -> (i32, i32) {
    %c0_i32 = arith.constant 0 : i32
    %c0_i32_0 = arith.constant 0 : i32
    %c0_i32_1 = arith.constant 0 : i32
    return %c0_i32, %c0_i32_0 : i32, i32
  }
  func.func @transform_4(%arg0: i32) -> (i32, i32) {
    %c0_i32 = arith.constant 0 : i32
    %c0_i32_0 = arith.constant 0 : i32
    %c0_i32_1 = arith.constant 0 : i32
    return %c0_i32, %c0_i32_0 : i32, i32
  }
  func.func @transform_5(%arg0: i32) -> (i32, i32, i32) {
    %c0_i32 = arith.constant 0 : i32
    %c0_i32_0 = arith.constant 0 : i32
    %c0_i32_1 = arith.constant 0 : i32
    return %arg0, %c0_i32, %c0_i32_0 : i32, i32, i32
  }
  func.func @transform_6(%arg0: i32) -> (i32, i32, i32) {
    %c0_i32 = arith.constant 0 : i32
    %c0_i32_0 = arith.constant 0 : i32
    %c0_i32_1 = arith.constant 0 : i32
    return %arg0, %c0_i32, %c0_i32_0 : i32, i32, i32
  }
}

module attributes {stable_mosaic.version = 11 : i64} {
  func.func @_mm_bias_res_kernel(%arg0: i32, %arg1: i32, %arg2: i32, %arg3: memref<34x256xbf16, #tpu.memory_space<vmem>>, %arg4: memref<256x128xbf16, #tpu.memory_space<vmem>>, %arg5: memref<1x128xf32, #tpu.memory_space<vmem>>, %arg6: memref<34x128xbf16, #tpu.memory_space<vmem>>, %arg7: memref<34x128xbf16, #tpu.memory_space<vmem>>, %arg8: memref<34x128xf32, #tpu.memory_space<vmem>>) attributes {dimension_semantics = [#tpu.dimension_semantics<parallel>, #tpu.dimension_semantics<parallel>, #tpu.dimension_semantics<arbitrary>], iteration_bounds = array<i64: 1, 1, 1>, scalar_prefetch = 0 : i64, scratch_operands = 1 : i64, tpu.core_type = #tpu.core_type<tc>, window_params = [{transform_indices = @transform_0, window_bounds = array<i64: 34, 256>}, {transform_indices = @transform_1, window_bounds = array<i64: 256, 128>}, {transform_indices = @transform_2, window_bounds = array<i64: 1, 128>}, {transform_indices = @transform_3, window_bounds = array<i64: 34, 128>}, {transform_indices = @transform_4, window_bounds = array<i64: 34, 128>}]} {
    %c0_i32 = arith.constant 0 : i32
    %0 = arith.cmpi eq, %arg2, %c0_i32 : i32
    %1 = arith.extui %0 : i1 to i32
    %c0_i32_0 = arith.constant 0 : i32
    %2 = arith.cmpi ne, %1, %c0_i32_0 : i32
    scf.if %2 {
      %cst_10 = arith.constant 0.000000e+00 : f32
      %12 = vector.broadcast %cst_10 : f32 to vector<34x128xf32>
      %c0_11 = arith.constant 0 : index
      %c0_12 = arith.constant 0 : index
      %13 = vector.load %arg8[%c0_11, %c0_12] : memref<34x128xf32, #tpu.memory_space<vmem>>, vector<34x128xf32>
      tpu.vector_store %arg8[%c0_11, %c0_12], %12 {strides = array<i32>} : memref<34x128xf32, #tpu.memory_space<vmem>>, vector<34x128xf32>,
    } else {
    }
    %c0 = arith.constant 0 : index
    %c0_1 = arith.constant 0 : index
    %3 = vector.load %arg8[%c0, %c0_1] : memref<34x128xf32, #tpu.memory_space<vmem>>, vector<34x128xf32>
    %c0_2 = arith.constant 0 : index
    %c0_3 = arith.constant 0 : index
    %4 = vector.load %arg3[%c0_2, %c0_3] : memref<34x256xbf16, #tpu.memory_space<vmem>>, vector<34x256xbf16>
    %c0_4 = arith.constant 0 : index
    %c0_5 = arith.constant 0 : index
    %5 = vector.load %arg4[%c0_4, %c0_5] : memref<256x128xbf16, #tpu.memory_space<vmem>>, vector<256x128xbf16>
    %cst = arith.constant dense<0.000000e+00> : vector<34x128xf32>
    %6 = tpu.matmul %4, %5, %cst {dimension_numbers = #tpu.dot_dimension_numbers<[1], [0], [0], [1], [0, 0, 1, 1], [], []>} : vector<34x256xbf16>, vector<256x128xbf16>, vector<34x128xf32> -> vector<34x128xf32>
    %7 = arith.addf %3, %6 : vector<34x128xf32>
    %c0_6 = arith.constant 0 : index
    %c0_7 = arith.constant 0 : index
    %8 = vector.load %arg8[%c0_6, %c0_7] : memref<34x128xf32, #tpu.memory_space<vmem>>, vector<34x128xf32>
    tpu.vector_store %arg8[%c0_6, %c0_7], %7 {strides = array<i32>} : memref<34x128xf32, #tpu.memory_space<vmem>>, vector<34x128xf32>,
    %c0_i32_8 = arith.constant 0 : i32
    %9 = arith.cmpi eq, %arg2, %c0_i32_8 : i32
    %10 = arith.extui %9 : i1 to i32
    %c0_i32_9 = arith.constant 0 : i32
    %11 = arith.cmpi ne, %10, %c0_i32_9 : i32
    scf.if %11 {
      %c0_10 = arith.constant 0 : index
      %c0_11 = arith.constant 0 : index
      %12 = vector.load %arg8[%c0_10, %c0_11] : memref<34x128xf32, #tpu.memory_space<vmem>>, vector<34x128xf32>
      %c0_12 = arith.constant 0 : index
      %c0_13 = arith.constant 0 : index
      %13 = vector.load %arg5[%c0_12, %c0_13] : memref<1x128xf32, #tpu.memory_space<vmem>>, vector<1x128xf32>
      %14 = vector.broadcast %13 : vector<1x128xf32> to vector<34x128xf32>
      %15 = arith.addf %12, %14 : vector<34x128xf32>
      %c0_14 = arith.constant 0 : index
      %c0_15 = arith.constant 0 : index
      %16 = vector.load %arg6[%c0_14, %c0_15] : memref<34x128xbf16, #tpu.memory_space<vmem>>, vector<34x128xbf16>
      %17 = arith.extf %16 : vector<34x128xbf16> to vector<34x128xf32>
      %18 = arith.addf %15, %17 : vector<34x128xf32>
      %19 = arith.truncf %18 : vector<34x128xf32> to vector<34x128xbf16>
      %c0_16 = arith.constant 0 : index
      %c0_17 = arith.constant 0 : index
      %20 = vector.load %arg7[%c0_16, %c0_17] : memref<34x128xbf16, #tpu.memory_space<vmem>>, vector<34x128xbf16>
      tpu.vector_store %arg7[%c0_16, %c0_17], %19 {strides = array<i32>} : memref<34x128xbf16, #tpu.memory_space<vmem>>, vector<34x128xbf16>,
    } else {
    }
    return
  }
  func.func @transform_0(%arg0: i32, %arg1: i32, %arg2: i32) -> (i32, i32) {
    %c0_i32 = arith.constant 0 : i32
    return %arg0, %arg2 : i32, i32
  }
  func.func @transform_1(%arg0: i32, %arg1: i32, %arg2: i32) -> (i32, i32) {
    %c0_i32 = arith.constant 0 : i32
    return %arg2, %arg1 : i32, i32
  }
  func.func @transform_2(%arg0: i32, %arg1: i32, %arg2: i32) -> (i32, i32) {
    %c0_i32 = arith.constant 0 : i32
    %c0_i32_0 = arith.constant 0 : i32
    return %c0_i32, %arg1 : i32, i32
  }
  func.func @transform_3(%arg0: i32, %arg1: i32, %arg2: i32) -> (i32, i32) {
    %c0_i32 = arith.constant 0 : i32
    return %arg0, %arg1 : i32, i32
  }
  func.func @transform_4(%arg0: i32, %arg1: i32, %arg2: i32) -> (i32, i32) {
    %c0_i32 = arith.constant 0 : i32
    return %arg0, %arg1 : i32, i32
  }
}

module attributes {stable_mosaic.version = 11 : i64} {
  func.func @_ln_mm_kernel(%arg0: i32, %arg1: i32, %arg2: memref<2x128xbf16, #tpu.memory_space<vmem>>, %arg3: memref<1x128xf32, #tpu.memory_space<vmem>>, %arg4: memref<1x128xf32, #tpu.memory_space<vmem>>, %arg5: memref<128x10xbf16, #tpu.memory_space<vmem>>, %arg6: memref<1x10xf32, #tpu.memory_space<vmem>>, %arg7: memref<2x10xf32, #tpu.memory_space<vmem>>) attributes {dimension_semantics = [#tpu.dimension_semantics<parallel>, #tpu.dimension_semantics<parallel>], iteration_bounds = array<i64: 1, 1>, scalar_prefetch = 0 : i64, scratch_operands = 0 : i64, tpu.core_type = #tpu.core_type<tc>, window_params = [{transform_indices = @transform_0, window_bounds = array<i64: 2, 128>}, {pipeline_mode = #tpu.pipeline_mode<synchronous>, transform_indices = @transform_1, window_bounds = array<i64: 1, 128>}, {pipeline_mode = #tpu.pipeline_mode<synchronous>, transform_indices = @transform_2, window_bounds = array<i64: 1, 128>}, {transform_indices = @transform_3, window_bounds = array<i64: 128, 10>}, {transform_indices = @transform_4, window_bounds = array<i64: 1, 10>}, {transform_indices = @transform_5, window_bounds = array<i64: 2, 10>}]} {
    %c0 = arith.constant 0 : index
    %c0_0 = arith.constant 0 : index
    %0 = vector.load %arg2[%c0, %c0_0] : memref<2x128xbf16, #tpu.memory_space<vmem>>, vector<2x128xbf16>
    %1 = arith.extf %0 : vector<2x128xbf16> to vector<2x128xf32>
    %c0_1 = arith.constant 0 : index
    %c0_2 = arith.constant 0 : index
    %2 = vector.load %arg3[%c0_1, %c0_2] : memref<1x128xf32, #tpu.memory_space<vmem>>, vector<1x128xf32>
    %c0_3 = arith.constant 0 : index
    %c0_4 = arith.constant 0 : index
    %3 = vector.load %arg4[%c0_3, %c0_4] : memref<1x128xf32, #tpu.memory_space<vmem>>, vector<1x128xf32>
    %cst = arith.constant dense<0.000000e+00> : vector<2xf32>
    %4 = vector.multi_reduction <add>, %1, %cst [1] : vector<2x128xf32> to vector<2xf32>
    %5 = vector.shape_cast %4 : vector<2xf32> to vector<2x1xf32>
    %cst_5 = arith.constant 1.280000e+02 : f32
    %6 = vector.broadcast %cst_5 : f32 to vector<2x1xf32>
    %7 = arith.divf %5, %6 : vector<2x1xf32>
    %8 = vector.broadcast %7 : vector<2x1xf32> to vector<2x128xf32>
    %9 = arith.subf %1, %8 : vector<2x128xf32>
    %10 = arith.mulf %9, %9 : vector<2x128xf32>
    %cst_6 = arith.constant dense<0.000000e+00> : vector<2xf32>
    %11 = vector.multi_reduction <add>, %10, %cst_6 [1] : vector<2x128xf32> to vector<2xf32>
    %12 = vector.shape_cast %11 : vector<2xf32> to vector<2x1xf32>
    %cst_7 = arith.constant 1.280000e+02 : f32
    %13 = vector.broadcast %cst_7 : f32 to vector<2x1xf32>
    %14 = arith.divf %12, %13 : vector<2x1xf32>
    %15 = vector.broadcast %7 : vector<2x1xf32> to vector<2x128xf32>
    %16 = arith.subf %1, %15 : vector<2x128xf32>
    %cst_8 = arith.constant 9.99999974E-6 : f32
    %17 = vector.broadcast %cst_8 : f32 to vector<2x1xf32>
    %18 = arith.addf %14, %17 : vector<2x1xf32>
    %19 = math.rsqrt %18 : vector<2x1xf32>
    %20 = vector.broadcast %19 : vector<2x1xf32> to vector<2x128xf32>
    %21 = arith.mulf %16, %20 : vector<2x128xf32>
    %22 = vector.broadcast %2 : vector<1x128xf32> to vector<2x128xf32>
    %23 = arith.mulf %21, %22 : vector<2x128xf32>
    %24 = vector.broadcast %3 : vector<1x128xf32> to vector<2x128xf32>
    %25 = arith.addf %23, %24 : vector<2x128xf32>
    %26 = arith.truncf %25 : vector<2x128xf32> to vector<2x128xbf16>
    %c0_9 = arith.constant 0 : index
    %c0_10 = arith.constant 0 : index
    %27 = vector.load %arg5[%c0_9, %c0_10] : memref<128x10xbf16, #tpu.memory_space<vmem>>, vector<128x10xbf16>
    %cst_11 = arith.constant dense<0.000000e+00> : vector<2x10xf32>
    %28 = tpu.matmul %26, %27, %cst_11 {dimension_numbers = #tpu.dot_dimension_numbers<[1], [0], [0], [1], [0, 0, 1, 1], [], []>} : vector<2x128xbf16>, vector<128x10xbf16>, vector<2x10xf32> -> vector<2x10xf32>
    %c0_12 = arith.constant 0 : index
    %c0_13 = arith.constant 0 : index
    %29 = vector.load %arg6[%c0_12, %c0_13] : memref<1x10xf32, #tpu.memory_space<vmem>>, vector<1x10xf32>
    %30 = vector.broadcast %29 : vector<1x10xf32> to vector<2x10xf32>
    %31 = arith.addf %28, %30 : vector<2x10xf32>
    %c0_14 = arith.constant 0 : index
    %c0_15 = arith.constant 0 : index
    %32 = vector.load %arg7[%c0_14, %c0_15] : memref<2x10xf32, #tpu.memory_space<vmem>>, vector<2x10xf32>
    tpu.vector_store %arg7[%c0_14, %c0_15], %31 {strides = array<i32>} : memref<2x10xf32, #tpu.memory_space<vmem>>, vector<2x10xf32>,
    return
  }
  func.func @transform_0(%arg0: i32, %arg1: i32) -> (i32, i32) {
    %c0_i32 = arith.constant 0 : i32
    %c0_i32_0 = arith.constant 0 : i32
    return %arg0, %c0_i32 : i32, i32
  }
  func.func @transform_1(%arg0: i32, %arg1: i32) -> (i32, i32) {
    %c0_i32 = arith.constant 0 : i32
    %c0_i32_0 = arith.constant 0 : i32
    %c0_i32_1 = arith.constant 0 : i32
    return %c0_i32, %c0_i32_0 : i32, i32
  }
  func.func @transform_2(%arg0: i32, %arg1: i32) -> (i32, i32) {
    %c0_i32 = arith.constant 0 : i32
    %c0_i32_0 = arith.constant 0 : i32
    %c0_i32_1 = arith.constant 0 : i32
    return %c0_i32, %c0_i32_0 : i32, i32
  }
  func.func @transform_3(%arg0: i32, %arg1: i32) -> (i32, i32) {
    %c0_i32 = arith.constant 0 : i32
    %c0_i32_0 = arith.constant 0 : i32
    return %c0_i32, %arg1 : i32, i32
  }
  func.func @transform_4(%arg0: i32, %arg1: i32) -> (i32, i32) {
    %c0_i32 = arith.constant 0 : i32
    %c0_i32_0 = arith.constant 0 : i32
    return %c0_i32, %arg1 : i32, i32
  }
  func.func @transform_5(%arg0: i32, %arg1: i32) -> (i32, i32) {
    %c0_i32 = arith.constant 0 : i32
    return %arg0, %arg1 : i32, i32
  }
}

</mosaic_0001>

<bundles_post_ra>
// kernel: vit_forward.11
= control target key start
LH: loop header
LB: loop body
LE: loop exit
PB: predicated region body
PF: predicated region fallthrough
CT: control target
= control target key end

     0   :  { %s1024_s18 = smov 0   ;;  %s1026_s19 = smov 0   ;;  %s1197_s0 = inlined_call_operand.vmem [shape: bf16[34,128], index: 0, kind: input, shape index: {}]   ;;  %s1198_s1 = inlined_call_operand.vmem [shape: f32[1,128], index: 1, kind: input, shape index: {}]   ;;  %s1199_s2 = inlined_call_operand.vmem [shape: f32[1,128], index: 2, kind: input, shape index: {}]   ;;  %s1200_s3 = inlined_call_operand.vmem [shape: bf16[128,384], index: 3, kind: input, shape index: {}]   ;;  %s1201_s4 = inlined_call_operand.vmem [shape: f32[1,384], index: 4, kind: input, shape index: {}]   ;;  %s1202_s5 = inlined_call_operand.vmem [shape: bf16[34,384], index: 5, kind: output, shape index: {}]  }
   0x1   :  { %s1028_s20 = smov 0   ;;  %s1030_s21 = smov 0  }
   0x2   :  { %s1032_s22 = smov 0  }
   0x3 LB: > { %s24_s23 = sadd.s32 1, %s986_s21  ;;  %s783_s24 = sadd.s32 4294967295, %s990_s22   ;;  %s990_s22 = sphi %s1032_s22, %s15_s22   ;;  %s986_s21 = sphi %s1030_s21, %s1207_s21   ;;  %s982_s20 = sphi %s1028_s20, %s1206_s20   ;;  %s978_s19 = sphi %s1026_s19, %s1205_s19   ;;  %s974_s18 = sphi %s1024_s18, %s1204_s18  }
   0x4   : > { %p25_p0 = scmp.ge.s32.totalorder %s24_s23, 3  ;;  %p109_p1 = scmp.ne.s32.totalorder %s978_s19, %s974_s18 }
   0x5   : > { %p110_p2 = scmp.eq.s32.totalorder %s990_s22, 0  ;;  %p167_p4 = scmp.eq.s32.totalorder %s783_s24, 2 }
   0x6   : > { %s1209_s23 = smov (%p25_p0, %s24_s23), 0  ;;  %s102_s26 = sadd.s32 1, %s978_s19 }
   0x7   : > { %p111_p3 = por %p110_p2, %p109_p1  ;;  %s99_s25 = ssub.s32 %s986_s21, %s1209_s23 }
   0x8   : > { %p100_p5 = scmp.eq.s32.totalorder %s99_s25, 0  ;;  %p1059_p6 = por %p167_p4, %p109_p1 }
   0x9   : > { %p787_p7 = scmp.ge.s32.totalorder %s990_s22, 3 }
   0xa   : > { %s1064_s28 = scalar_select %p100_p5, %s978_s19, %s102_s26  }
   0xb   : > { %204 = sbr.rel (%p787_p7) target bundleno = 30 (0x1e), region = 28 }
  0x10   : > { %207 = sbr.rel (!%p111_p3) target bundleno = 30 (0x1e), region = 32  ;;  %s209_s29 = sand.u32 (%p111_p3), 1, %s978_s19  }
  0x11   : > { %s789_s30 = sshll.u32 (%p111_p3), %s986_s21, 2  ;;  %s788_s6 = sshll.u32 (%p111_p3), %s209_s29, 6 }
  0x12   : > { %s1072_s9 = scalar_lea.vmem (%p111_p3), %s1200_s3, %s789_s30  ;;  %s211_s10 = scalar_lea.vmem (%p111_p3), [#allocation2], %s788_s6 }
  0x13   : > { %v230_v0 = vld [vmem:[%s1072_s9] sm:$0xf] (%p111_p3)  ;;  %v232_v1 = vld [vmem:[%s1072_s9 + $0xc] sm:$0xf] (%p111_p3)  ;;  %v234_v2 = vld [vmem:[%s1072_s9 + $0x18] sm:$0xf] (%p111_p3) }
  0x14   : > { %231 = vst [vmem:[%s211_s10] sm:$0xf] (%p111_p3), %v230_v0  ;;  %233 = vst [vmem:[%s211_s10 + $0x4] sm:$0xf] (%p111_p3), %v232_v1  ;;  %v236_v3 = vld [vmem:[%s1072_s9 + $0x24] sm:$0xf] (%p111_p3) }
  0x15   : > { %v238_v4 = vld [vmem:[%s1072_s9 + $0x30] sm:$0xf]  ;;  %235 = vst [vmem:[%s211_s10 + $0x8] sm:$0xf] %v234_v2  ;;  %237 = vst [vmem:[%s211_s10 + $0xc] sm:$0xf] %v236_v3 }
  0x16   : > { %239 = vst [vmem:[%s211_s10 + $0x10] sm:$0xf] %v238_v4  ;;  %v240_v5 = vld [vmem:[%s1072_s9 + $0x3c] sm:$0xf]  ;;  %v242_v6 = vld [vmem:[%s1072_s9 + $0x48] sm:$0xf] }
  0x17   : > { %v244_v7 = vld [vmem:[%s1072_s9 + $0x54] sm:$0xf]  ;;  %241 = vst [vmem:[%s211_s10 + $0x14] sm:$0xf] %v240_v5  ;;  %243 = vst [vmem:[%s211_s10 + $0x18] sm:$0xf] %v242_v6 }
  0x18   : > { %245 = vst [vmem:[%s211_s10 + $0x1c] sm:$0xf] %v244_v7  ;;  %v246_v8 = vld [vmem:[%s1072_s9 + $0x60] sm:$0xf]  ;;  %v248_v9 = vld [vmem:[%s1072_s9 + $0x6c] sm:$0xf] }
  0x19   : > { %v250_v10 = vld [vmem:[%s1072_s9 + $0x78] sm:$0xf]  ;;  %247 = vst [vmem:[%s211_s10 + $0x20] sm:$0xf] %v246_v8  ;;  %249 = vst [vmem:[%s211_s10 + $0x24] sm:$0xf] %v248_v9 }
  0x1a   : > { %251 = vst [vmem:[%s211_s10 + $0x28] sm:$0xf] %v250_v10  ;;  %v252_v11 = vld [vmem:[%s1072_s9 + $0x84] sm:$0xf]  ;;  %v254_v12 = vld [vmem:[%s1072_s9 + $0x90] sm:$0xf] }
  0x1b   : > { %v256_v13 = vld [vmem:[%s1072_s9 + $0x9c] sm:$0xf]  ;;  %253 = vst [vmem:[%s211_s10 + $0x2c] sm:$0xf] %v252_v11  ;;  %255 = vst [vmem:[%s211_s10 + $0x30] sm:$0xf] %v254_v12 }
  0x1c   : > { %257 = vst [vmem:[%s211_s10 + $0x34] sm:$0xf] %v256_v13  ;;  %v258_v14 = vld [vmem:[%s1072_s9 + $0xa8] sm:$0xf]  ;;  %v260_v15 = vld [vmem:[%s1072_s9 + $0xb4] sm:$0xf] }
  0x1d   : > { %259 = vst [vmem:[%s211_s10 + $0x38] sm:$0xf] %v258_v14  ;;  %261 = vst [vmem:[%s211_s10 + $0x3c] sm:$0xf] %v260_v15 }
  0x1e PF: > { %p790_p8 = scmp.ge.s32.totalorder %s990_s22, 1  ;;  %p322_p9 = scmp.lt.s32.totalorder %s990_s22, 4 }
  0x20   : > { %p323_p10 = pnand %p790_p8, %p322_p9 }
  0x21   : > { %s329_s17 = sand.u32 (!%p323_p10), 1, %s974_s18   ;;  %p369_p11 = scmp.lt.s32.totalorder (!%p323_p10), %s982_s20, 2 }
  0x22   : > { %326 = sbr.rel (%p323_p10) target bundleno = 569 (0x239), region = 77  ;;  %s791_s24 = sshll.u32 (!%p323_p10), %s329_s17, 6 }
  0x23   : > { %s1127_s25 = scalar_lea.vmem (!%p323_p10), [#allocation2], %s791_s24  ;;  %s891_s11 = smul.u32 (!%p323_p10), 20, %s329_s17 }
  0x25   : > { %s362_s12 = scalar_lea.vmem (!%p323_p10), [#allocation3], %s891_s11 }
  0x27   : > { %v834_v16 = vld [vmem:[%s1197_s0 + $0x8] sm:$0xff]   ;;  %v817_v17 = vld [vmem:[%s1197_s0] sm:$0xff]   ;;  %v378_v20 = vld [vmem:[%s1197_s0 + $0x10] sm:$0x1]  ;;  %vm394_vm0 = vcmask 1041408   ;;  %v992_v25 = vmov 0.0  }
  0x28   : > { %v822_v18 = vunpack.c.l.bf16 %v834_v16  ;;  %v818_v19 = vunpack.c.l.bf16 %v817_v17  ;;  %v823_v21 = vunpack.c.h.bf16 %v834_v16  ;;  %v819_v22 = vunpack.c.h.bf16 %v817_v17  ;;  %875 = vmatprep.subr.bf16.mxu1 %v992_v25  ;;  %847 = vmatprep.subr.bf16.mxu0 %v992_v25  ;;  %v934_v46 = vld [vmem:[%s1127_s25 + $0x38] sm:$0xff]   ;;  %v935_v48 = vld [vmem:[%s1127_s25 + $0x30] sm:$0xff]   ;;  %v936_v49 = vld [vmem:[%s1127_s25 + $0x28] sm:$0xff]   ;;  %s370_s7 = scalar_select %p369_p11, %s982_s20, 2 }
  0x29   : > { %v383_v23 = vunpack.c.l.bf16 %v378_v20  ;;  %883 = vmatpush3.bf16.msra.mxu1 %v934_v46  ;;  %848 = vmatpush3.bf16.msra.mxu0 %v934_v46  ;;  %v937_v50 = vld [vmem:[%s1127_s25 + $0x20] sm:$0xff]   ;;  %v938_v51 = vld [vmem:[%s1127_s25 + $0x18] sm:$0xff]   ;;  %vm993_vm1 = vmmov 0   ;;  %v939_v52 = vld [vmem:[%s1127_s25 + $0x10] sm:$0xff]   ;;  %s808_s18 = sshll.u32 (%p1059_p6), %s982_s20, 2 }
  0x2a   : > { %390 = vadd.xlane.f32.xlu0 %v822_v18  ;;  %386 = vadd.xlane.f32.xlu1 %v818_v19  ;;  %v940_v53 = vld [vmem:[%s1127_s25 + $0x8] sm:$0xff]   ;;  %v941_v54 = vld [vmem:[%s1127_s25] sm:$0xff]   ;;  %s371_s10 = scalar_lea.vmem %s1201_s4, %s370_s7  ;;  %s634_s15 = scalar_lea.vmem (%p1059_p6), %s1202_s5, %s808_s18 }
  0x2b   : > { %v395_v24 = vsel %vm394_vm0, %v383_v23, 0.0  ;;  %876 = vmatprep.subr.bf16.mxu1 %v992_v25  ;;  %849 = vmatprep.subr.bf16.mxu0 %v992_v25  ;;  %v792_v8 = vld [vmem:[%s1198_s1] ss:$0 sm:$0xff] }
  0x2c   : > { %867 = vmatprep.mubr.msk.bf16.mxu1 %vm993_vm1, %v992_v25  ;;  %863 = vmatprep.mubr.msk.bf16.mxu0 %vm993_vm1, %v992_v25  ;;  %v793_v13 = vld [vmem:[%s1199_s2] ss:$0 sm:$0xff] }
  0x2d   : > { %884 = vmatpush3.bf16.msra.mxu1 %v935_v48  ;;  %850 = vmatpush3.bf16.msra.mxu0 %v935_v48 }
  0x2e   : > { %392 = vadd.xlane.f32.xlu0 %v823_v21  ;;  %388 = vadd.xlane.f32.xlu1 %v819_v22 }
  0x2f   : > { %877 = vmatprep.subr.bf16.mxu1 %v992_v25  ;;  %851 = vmatprep.subr.bf16.mxu0 %v992_v25 }
  0x31   : > { %885 = vmatpush3.bf16.msra.mxu1 %v936_v49  ;;  %852 = vmatpush3.bf16.msra.mxu0 %v936_v49 }
  0x32   : > { %396 = vadd.xlane.f32.xlu0 %v395_v24  ;;  %878 = vmatprep.subr.bf16.mxu1 %v992_v25 }
  0x33   : > { %853 = vmatprep.subr.bf16.mxu0 %v992_v25 }
  0x35   : > { %886 = vmatpush3.bf16.msra.mxu1 %v937_v50  ;;  %854 = vmatpush3.bf16.msra.mxu0 %v937_v50 }
  0x36   : > { %879 = vmatprep.subr.bf16.mxu1 %v992_v25  ;;  %855 = vmatprep.subr.bf16.mxu0 %v992_v25 }
  0x39   : > { %887 = vmatpush3.bf16.msra.mxu1 %v938_v51  ;;  %856 = vmatpush3.bf16.msra.mxu0 %v938_v51 }
  0x3a   : > { %880 = vmatprep.subr.bf16.mxu1 %v992_v25  ;;  %857 = vmatprep.subr.bf16.mxu0 %v992_v25 }
  0x3d   : > { %888 = vmatpush3.bf16.msra.mxu1 %v939_v52  ;;  %858 = vmatpush3.bf16.msra.mxu0 %v939_v52 }
  0x3e   : > { %881 = vmatprep.subr.bf16.mxu1 %v992_v25  ;;  %859 = vmatprep.subr.bf16.mxu0 %v992_v25 }
  0x41   : > { %889 = vmatpush3.bf16.msra.mxu1 %v940_v53  ;;  %860 = vmatpush3.bf16.msra.mxu0 %v940_v53 }
  0x42   : > { %882 = vmatprep.subr.bf16.mxu1 %v992_v25  ;;  %861 = vmatprep.subr.bf16.mxu0 %v992_v25 }
  0x45   : > { %890 = vmatpush3.bf16.msra.mxu1 %v941_v54  ;;  %862 = vmatpush3.bf16.msra.mxu0 %v941_v54 }
  0xb3   : > { %v391_v26 = vpop.xlane.xlu0 %390  ;;  %v387_v27 = vpop.xlane.xlu1 %386 }
  0xb4   : > { %v401_v28 = vmul.f32 0.0078125, %v391_v26  ;;  %v399_v29 = vmul.f32 0.0078125, %v387_v27 }
  0xb6   : > { %v1104_v30 = vsub.f32 %v822_v18, %v401_v28  ;;  %v1106_v31 = vsub.f32 %v818_v19, %v399_v29 }
  0xb7   : > { %v393_v32 = vpop.xlane.xlu0 %392  ;;  %v389_v33 = vpop.xlane.xlu1 %388 }
  0xb8   : > { %v402_v34 = vmul.f32 0.0078125, %v393_v32  ;;  %v411_v35 = vmul.f32 %v1104_v30, %v1104_v30  ;;  %v400_v36 = vmul.f32 0.0078125, %v389_v33  ;;  %v409_v39 = vmul.f32 %v1106_v31, %v1106_v31  ;;  %v794_v33 = vld [vmem:[%s371_s10] ss:$0 sm:$0xff] }
  0xba   : > { %v1110_v37 = vsub.f32 %v823_v21, %v402_v34  ;;  %418 = vadd.xlane.f32.xlu1 %v411_v35  ;;  %v1112_v38 = vsub.f32 %v819_v22, %v400_v36 }
  0xbb   : > { %v397_v40 = vpop.xlane.xlu0 %396 }
  0xbc   : > { %v403_v41 = vmul.f32 0.0078125, %v397_v40  ;;  %v412_v42 = vmul.f32 %v1110_v37, %v1110_v37  ;;  %v410_v44 = vmul.f32 %v1112_v38, %v1112_v38 }
  0xbe   : > { %v1118_v43 = vsub.f32 %v383_v23, %v403_v41  ;;  %420 = vadd.xlane.f32.xlu0 %v412_v42  ;;  %414 = vadd.xlane.f32.xlu1 %v409_v39 }
  0xc0   : > { %v413_v45 = vmul.f32 %v1118_v43, %v1118_v43 }
  0xc2   : > { %416 = vadd.xlane.f32.xlu0 %v410_v44  ;;  %v422_v47 = vsel %vm394_vm0, %v413_v45, 0.0 }
  0xc3   : > { %423 = vadd.xlane.f32.xlu1 %v422_v47 }
 0x143   : > { %v419_v55 = vpop.xlane.xlu1 %418 }
 0x144   : > { %v427_v56 = vmul.f32 0.0078125, %v419_v55 }
 0x146   : > { %v432_v57 = vadd.f32 1e-05, %v427_v56 }
 0x147   : > { %v421_v58 = vpop.xlane.xlu0 %420  ;;  %v415_v59 = vpop.xlane.xlu1 %414 }
 0x148   : > { %942 = vrsqrt.f32 %v432_v57  ;;  %v428_v60 = vmul.f32 0.0078125, %v421_v58  ;;  %v425_v61 = vmul.f32 0.0078125, %v415_v59 }
 0x14a   : > { %v433_v62 = vadd.f32 1e-05, %v428_v60  ;;  %v430_v63 = vadd.f32 1e-05, %v425_v61 }
 0x14b   : > { %v417_v0 = vpop.xlane.xlu0 %416 }
 0x14c   : > { %944 = vrsqrt.f32 %v433_v62  ;;  %v426_v1 = vmul.f32 0.0078125, %v417_v0  ;;  %v424_v2 = vpop.xlane.xlu1 %423 }
 0x14d   : > { %946 = vrsqrt.f32 %v430_v63  ;;  %v429_v3 = vmul.f32 0.0078125, %v424_v2 }
 0x14e   : > { %v431_v4 = vadd.f32 1e-05, %v426_v1 }
 0x14f   : > { %v434_v5 = vadd.f32 1e-05, %v429_v3 }
 0x150   : > { %948 = vrsqrt.f32 %v431_v4 }
 0x151   : > { %950 = vrsqrt.f32 %v434_v5 }
 0x155   : > { %v943_v6 = vpop.eup %942 }
 0x156   : > { %v442_v7 = vmul.f32 %v943_v6, %v1104_v30 }
 0x158   : > { %v453_v12 = vmul.f32 %v792_v8, %v442_v7 }
 0x159   : > { %v945_v9 = vpop.eup %944 }
 0x15a   : > { %v947_v10 = vpop.eup %946  ;;  %v443_v11 = vmul.f32 %v945_v9, %v1110_v37  ;;  %v464_v18 = vadd.f32 %v793_v13, %v453_v12 }
 0x15b   : > { %v440_v14 = vmul.f32 %v947_v10, %v1106_v31 }
 0x15c   : > { %v454_v15 = vmul.f32 %v792_v8, %v443_v11 }
 0x15d   : > { %v949_v16 = vpop.eup %948  ;;  %v451_v21 = vmul.f32 %v792_v8, %v440_v14 }
 0x15e   : > { %v951_v17 = vpop.eup %950  ;;  %v465_v19 = vadd.f32 %v793_v13, %v454_v15  ;;  %v441_v20 = vmul.f32 %v949_v16, %v1112_v38 }
 0x15f   : > { %v444_v22 = vmul.f32 %v951_v17, %v1118_v43  ;;  %v462_v27 = vadd.f32 %v793_v13, %v451_v21 }
 0x160   : > { %v468_v23 = vpack.c.bf16 %v465_v19, %v464_v18  ;;  %v452_v24 = vmul.f32 %v792_v8, %v441_v20 }
 0x161   : > { %v455_v26 = vmul.f32 %v792_v8, %v444_v22 }
 0x162   : > { %868 = vmatmul.mubr.bf16.vlgmr.msra.gmra.mxu1 %v468_v23  ;;  %v463_v28 = vadd.f32 %v793_v13, %v452_v24 }
 0x163   : > { %871 = vmatprep.mubr.msk.bf16.mxu1 %vm993_vm1, %v992_v25  ;;  %v466_v30 = vadd.f32 %v793_v13, %v455_v26 }
 0x164   : > { %v467_v29 = vpack.c.bf16 %v463_v28, %v462_v27 }
 0x165   : > { %v469_v31 = vpack.c.bf16 %v466_v30, %v466_v30 }
 0x166   : > { %864 = vmatmul.mubr.bf16.vlgmr.msra.gmra.mxu0 %v467_v29 }
 0x16a   : > { %872 = vmatmul.mubr.bf16.gmra.mxu1 %v469_v31 }
 0x222   : > { %v583_v32 = vpop.f32.mrf.mxu1 }
 0x223   : > { %v584_v37 = vadd.f32 %v794_v33, %v583_v32 }
 0x224   : > { %v869_v34 = vpop.f32.mrf.mxu1 }
 0x226   : > { %v575_v35 = vpop.f32.mrf.mxu0  ;;  %v586_v36 = vpop.f32.mrf.mxu1 }
 0x227   : > { %v587_v25 = vadd.f32 %v794_v33, %v586_v36  ;;  %v576_v43 = vadd.f32 %v794_v33, %v575_v35 }
 0x228   : > { %v865_v38 = vpop.f32.mrf.mxu0  ;;  %v870_v39 = vpop.f32.mrf.mxu1 }
 0x229   : > { %v832_v40 = vpack.c.bf16 %v587_v25, %v584_v37 }
 0x22a   : > { %v578_v41 = vpop.f32.mrf.mxu0  ;;  %v591_v42 = vpop.f32.mrf.mxu1 }
 0x22b   : > { %835 = vst [vmem:[%s362_s12 + $0x8] sm:$0xff] %v832_v40   ;;  %v579_v44 = vadd.f32 %v794_v33, %v578_v41  ;;  %v592_v45 = vadd.f32 %v794_v33, %v591_v42 }
 0x22c   : > { %v866_v46 = vpop.f32.mrf.mxu0  ;;  %v873_v47 = vpop.f32.mrf.mxu1  ;;  %629 = sbr.rel (!%p1059_p6) target bundleno = 569 (0x239), region = 85 }
 0x22d   : > { %v827_v48 = vpack.c.bf16 %v579_v44, %v576_v43  ;;  %v815_v49 = vpack.c.bf16 %v592_v45, %v592_v45 }
 0x22e   : > { %v594_v50 = vpop.f32.mrf.mxu1 }
 0x22f   : > { %828 = vst [vmem:[%s362_s12] sm:$0xff] %v827_v48   ;;  %622 = vst [vmem:[%s362_s12 + $0x10] sm:$0x1] %v815_v49 }
 0x230   : > { %v874_v51 = vpop.f32.mrf.mxu1 }
 0x232   : > { %v655_v54 = vld [vmem:[%s362_s12 + $0x8] sm:$0xf]  ;;  %v657_v55 = vld [vmem:[%s362_s12 + $0xc] sm:$0xf] }
 0x233   : > { %656 = vst [vmem:[%s634_s15 + $0x18] sm:$0xf] %v655_v54  ;;  %658 = vst [vmem:[%s634_s15 + $0x24] sm:$0xf] %v657_v55 }
 0x236   : > { %v651_v52 = vld [vmem:[%s362_s12] sm:$0xf]  ;;  %v653_v53 = vld [vmem:[%s362_s12 + $0x4] sm:$0xf]  ;;  %v659_v56 = vld [vmem:[%s362_s12 + $0x10] sm:$0xf] }
 0x237   : > { %652 = vst [vmem:[%s634_s15] sm:$0xf] %v651_v52  ;;  %654 = vst [vmem:[%s634_s15 + $0xc] sm:$0xf] %v653_v53 }
 0x238   : > { %660 = vst [vmem:[%s634_s15 + $0x30] sm:$0xf] %v659_v56 }
 0x239 PF: > { %s15_s22 = sadd.s32 1, %s990_s22   ;;  %s1204_s18 = smov %s978_s19 }
 0x23a   : > { %p12_p12 = scmp.ge.s32.totalorder %s15_s22, 5   ;;  %s1205_s19 = smov %s1064_s28 }
 0x23b   : > { %s1206_s20 = smov %s986_s21  ;;  %s1207_s21 = smov %s1209_s23 }
 0x23c   :  { %14 = sbr.rel (!%p12_p12) target bundleno = 3 (0x3), region = 163 }

// kernel: vit_forward.10
= control target key start
LH: loop header
LB: loop body
LE: loop exit
PB: predicated region body
PF: predicated region fallthrough
CT: control target
= control target key end

     0   :  { %s680_s12 = smov 0   ;;  %s682_s13 = smov 0   ;;  %s791_s0 = inlined_call_operand.vmem [shape: bf16[2,17,192], index: 0, kind: input, shape index: {}]   ;;  %s792_s1 = inlined_call_operand.vmem [shape: bf16[192,128], index: 1, kind: input, shape index: {}]   ;;  %s793_s2 = inlined_call_operand.vmem [shape: f32[17,128], index: 2, kind: input, shape index: {}]   ;;  %s794_s3 = inlined_call_operand.vmem [shape: bf16[2,17,128], index: 3, kind: output, shape index: {}]  }
   0x1   :  { %s684_s14 = smov 0  }
   0x2 LB: > { %s25_s15 = sadd.s32 1, %s653_s13  ;;  %p533_p0 = scmp.ge.s32.totalorder %s657_s14, 1  ;;  %s657_s14 = sphi %s684_s14, %s13_s14   ;;  %s653_s13 = sphi %s682_s13, %s796_s13   ;;  %s649_s12 = sphi %s680_s12, %s795_s12  }
   0x3   : > { %p27_p1 = scmp.ge.s32.totalorder %s25_s15, 2  ;;  %p169_p2 = scmp.lt.s32.totalorder %s657_s14, 3 }
   0x5   : > { %s798_s15 = smov (%p27_p1, %s25_s15), 0  ;;  %p170_p3 = pnand %p533_p0, %p169_p2 }
   0x6   : > { %p204_p4 = scmp.lt.s32.totalorder (!%p170_p3), %s649_s12, 1 }
   0x7   : > { %173 = sbr.rel (%p170_p3) target bundleno = 263 (0x107), region = 32 }
   0xc   : > { %v618_v0 = vld [vmem:[%s792_s1 + $0x38] sm:$0xff]   ;;  %v659_v1 = vmov 0   ;;  %v619_v2 = vld [vmem:[%s792_s1 + $0x30] sm:$0xff]   ;;  %s800_s12 = smov (!%p204_p4, %s649_s12), 1  ;;  %v620_v3 = vld [vmem:[%s792_s1 + $0x28] sm:$0xff]   ;;  %vm343_vm0 = vcmask 523264  }
   0xd   : > { %350 = vmatprep.subr.bf16.mxu0 %v659_v1  ;;  %567 = vmatprep.subr.bf16.mxu1 %v659_v1  ;;  %s591_s22 = smul.u32 24, %s800_s12  ;;  %v621_v4 = vld [vmem:[%s792_s1 + $0x20] sm:$0xff]   ;;  %v622_v7 = vld [vmem:[%s792_s1 + $0x18] sm:$0xff]   ;;  %v623_v9 = vld [vmem:[%s792_s1 + $0x10] sm:$0xff]   ;;  %vm413_vm1 = vcmask 1040384  }
   0xe   : > { %351 = vmatpush1.bf16.msra.mxu0 %v618_v0  ;;  %579 = vmatpush1.bf16.msra.mxu1 %v618_v0  ;;  %v624_v10 = vld [vmem:[%s792_s1 + $0x8] sm:$0xff]   ;;  %v625_v11 = vld [vmem:[%s792_s1] sm:$0xff]   ;;  %v626_v12 = vld [vmem:[%s792_s1 + $0x58] sm:$0xff]   ;;  %s592_s21 = smul.u32 12, %s800_s12  ;;  %vm414_vm2 = vsmask.f32 256 }
   0xf   : > { %352 = vmatprep.subr.bf16.mxu0 %v659_v1  ;;  %568 = vmatprep.subr.bf16.mxu1 %v659_v1  ;;  %s722_s27 = scalar_lea.vmem %s791_s0, %s591_s22  ;;  %v627_v13 = vld [vmem:[%s792_s1 + $0x50] sm:$0xff]   ;;  %v628_v14 = vld [vmem:[%s792_s1 + $0x48] sm:$0xff]   ;;  %v629_v15 = vld [vmem:[%s792_s1 + $0x40] sm:$0xff]  }
  0x10   : > { %v632_v5 = vld [vmem:[%s722_s27 + $0x4] ss:$8 sps:$4 sm:$0xff]   ;;  %v228_v6 = vld [vmem:[%s722_s27 + $0x10] sm:$0x11]  ;;  %v630_v16 = vld [vmem:[%s722_s27] ss:$8 sps:$4 sm:$0xff]   ;;  %s224_s26 = scalar_lea.vmem %s794_s3, %s592_s21 }
  0x11   : > { %v539_v8 = vcombine.high %v228_v6, %v228_v6  ;;  %552 = vmatprep.mubr.msk.bf16.mxu0 %vm343_vm0, %v632_v5  ;;  %v538_v17 = vcombine.low %v228_v6, %v228_v6  ;;  %v255_v18 = vld [vmem:[%s793_s2 + $0x10] sm:$0x1]  ;;  %v253_v21 = vld [vmem:[%s793_s2] sm:$0xff]  ;;  %vm415_vm3 = vmand %vm413_vm1, %vm414_vm2 }
  0x12   : > { %353 = vmatpush1.bf16.msra.mxu0 %v619_v2  ;;  %580 = vmatpush1.bf16.msra.mxu1 %v619_v2  ;;  %v416_v23 = vld [vmem:[%s224_s26 + $0x8] sm:$0x1] }
  0x13   : > { %354 = vmatprep.subr.bf16.mxu0 %v659_v1  ;;  %569 = vmatprep.subr.bf16.mxu1 %v659_v1  ;;  %v254_v26 = vld [vmem:[%s793_s2 + $0x8] sm:$0xff] }
  0x14   : > { %553 = vmatprep.mubr.msk.bf16.mxu1 %vm343_vm0, %v539_v8 }
  0x16   : > { %355 = vmatpush1.bf16.msra.mxu0 %v620_v3  ;;  %581 = vmatpush1.bf16.msra.mxu1 %v620_v3 }
  0x17   : > { %356 = vmatprep.subr.bf16.mxu0 %v659_v1  ;;  %570 = vmatprep.subr.bf16.mxu1 %v659_v1 }
  0x1a   : > { %357 = vmatpush1.bf16.msra.mxu0 %v621_v4  ;;  %582 = vmatpush1.bf16.msra.mxu1 %v621_v4 }
  0x1b   : > { %358 = vmatprep.subr.bf16.mxu0 %v659_v1  ;;  %571 = vmatprep.subr.bf16.mxu1 %v659_v1 }
  0x1e   : > { %359 = vmatpush1.bf16.msra.mxu0 %v622_v7  ;;  %583 = vmatpush1.bf16.msra.mxu1 %v622_v7 }
  0x1f   : > { %360 = vmatprep.subr.bf16.mxu0 %v659_v1  ;;  %572 = vmatprep.subr.bf16.mxu1 %v659_v1 }
  0x22   : > { %361 = vmatpush1.bf16.msra.mxu0 %v623_v9  ;;  %584 = vmatpush1.bf16.msra.mxu1 %v623_v9 }
  0x23   : > { %362 = vmatprep.subr.bf16.mxu0 %v659_v1  ;;  %573 = vmatprep.subr.bf16.mxu1 %v659_v1 }
  0x26   : > { %363 = vmatpush1.bf16.msra.mxu0 %v624_v10  ;;  %585 = vmatpush1.bf16.msra.mxu1 %v624_v10 }
  0x27   : > { %364 = vmatprep.subr.bf16.mxu0 %v659_v1  ;;  %574 = vmatprep.subr.bf16.mxu1 %v659_v1 }
  0x2a   : > { %365 = vmatpush1.bf16.msra.mxu0 %v625_v11  ;;  %586 = vmatpush1.bf16.msra.mxu1 %v625_v11 }
  0x2b   : > { %374 = vmatprep.subr.bf16.mxu0 %v659_v1  ;;  %575 = vmatprep.subr.bf16.mxu1 %v659_v1 }
  0x2e   : > { %375 = vmatpush2.bf16.msra.mxu0 %v626_v12  ;;  %587 = vmatpush2.bf16.msra.mxu1 %v626_v12 }
  0x2f   : > { %376 = vmatprep.subr.bf16.mxu0 %v659_v1  ;;  %576 = vmatprep.subr.bf16.mxu1 %v659_v1 }
  0x32   : > { %377 = vmatpush2.bf16.msra.mxu0 %v627_v13  ;;  %588 = vmatpush2.bf16.msra.mxu1 %v627_v13 }
  0x33   : > { %378 = vmatprep.subr.bf16.mxu0 %v659_v1  ;;  %577 = vmatprep.subr.bf16.mxu1 %v659_v1 }
  0x36   : > { %379 = vmatpush2.bf16.msra.mxu0 %v628_v14  ;;  %589 = vmatpush2.bf16.msra.mxu1 %v628_v14 }
  0x37   : > { %380 = vmatprep.subr.bf16.mxu0 %v659_v1  ;;  %578 = vmatprep.subr.bf16.mxu1 %v659_v1 }
  0x3a   : > { %381 = vmatpush2.bf16.msra.mxu0 %v629_v15  ;;  %590 = vmatpush2.bf16.msra.mxu1 %v629_v15 }
  0x3d   : > { %383 = vmatmul.mubr.bf16.vlgmr.msra.gmra.mxu0 %v630_v16  ;;  %391 = vmatmul.mubr.bf16.vlgmr.msra.gmra.mxu1 %v538_v17 }
  0xfd   : > { %v384_v19 = vpop.f32.mrf.mxu0  ;;  %v392_v20 = vpop.f32.mrf.mxu1 }
  0xfe   : > { %v393_v22 = vadd.f32 %v392_v20, %v255_v18  ;;  %v385_v30 = vadd.f32 %v384_v19, %v253_v21 }
  0xff   : > { %v386_v24 = vpop.f32.mrf.mxu0  ;;  %v394_v25 = vpop.f32.mrf.mxu1 }
 0x100   : > { %v561_v27 = vpack.c.bf16 %v393_v22, %v393_v22 }
 0x101   : > { %v387_v28 = vpop.f32.mrf.mxu0  ;;  %v395_v29 = vpop.f32.mrf.mxu1 }
 0x102   : > { %v417_v31 = vsel %vm415_vm3, %v561_v27, %v416_v23  ;;  %v388_v32 = vadd.f32 %v387_v28, %v254_v26 }
 0x103   : > { %418 = vst [vmem:[%s224_s26 + $0x8] sm:$0x1] %v417_v31  ;;  %v389_v33 = vpop.f32.mrf.mxu0  ;;  %v396_v34 = vpop.f32.mrf.mxu1 }
 0x104   : > { %v565_v35 = vpack.c.bf16 %v388_v32, %v385_v30 }
 0x106   : > { %566 = vst [vmem:[%s224_s26] sm:$0xff] %v565_v35  }
 0x107 PF: > { %s13_s14 = sadd.s32 1, %s657_s14   ;;  %s795_s12 = smov %s653_s13 }
 0x108   : > { %p10_p5 = scmp.ge.s32.totalorder %s13_s14, 4   ;;  %s796_s13 = smov %s798_s15 }
 0x10a   :  { %12 = sbr.rel (!%p10_p5) target bundleno = 2 (0x2), region = 68 }

// kernel: vit_forward.13
= control target key start
LH: loop header
LB: loop body
LE: loop exit
PB: predicated region body
PF: predicated region fallthrough
CT: control target
= control target key end

     0   :  { %vm41_vm0 = vcmask 1041408   ;;  %v525_v43 = vmov 0   ;;  %s734_s0 = inlined_call_operand.vmem [shape: bf16[34,128], index: 0, kind: input, shape index: {}]   ;;  %s735_s3 = inlined_call_operand.vmem [shape: bf16[128,256], index: 3, kind: input, shape index: {}]   ;;  %s736_s1 = inlined_call_operand.vmem [shape: f32[1,128], index: 1, kind: input, shape index: {}]   ;;  %s737_s2 = inlined_call_operand.vmem [shape: f32[1,128], index: 2, kind: input, shape index: {}]   ;;  %s738_s4 = inlined_call_operand.vmem [shape: f32[1,256], index: 4, kind: input, shape index: {}]   ;;  %s739_s5 = inlined_call_operand.vmem [shape: bf16[34,256], index: 5, kind: output, shape index: {}]  }
   0x1   :  { %v453_v0 = vld [vmem:[%s734_s0 + $0x8] sm:$0xff]   ;;  %v446_v1 = vld [vmem:[%s734_s0] sm:$0xff]   ;;  %v25_v4 = vld [vmem:[%s734_s0 + $0x10] sm:$0x1]  ;;  %267 = vmatprep.mubr.bf16.mxu1 %v525_v43  ;;  %257 = vmatprep.mubr.bf16.mxu0 %v525_v43 }
   0x2   :  { %v451_v2 = vunpack.c.l.bf16 %v453_v0  ;;  %v447_v3 = vunpack.c.l.bf16 %v446_v1  ;;  %v452_v5 = vunpack.c.h.bf16 %v453_v0  ;;  %v448_v6 = vunpack.c.h.bf16 %v446_v1  ;;  %v471_v9 = vld [vmem:[%s735_s3 + $0x74] ss:$8 sps:$4 sm:$0xff]   ;;  %v473_v10 = vld [vmem:[%s735_s3 + $0x70] ss:$8 sps:$4 sm:$0xff]   ;;  %v474_v32 = vld [vmem:[%s735_s3 + $0x64] ss:$8 sps:$4 sm:$0xff]  }
   0x3   :  { %v30_v7 = vunpack.c.l.bf16 %v25_v4  ;;  %454 = vmatprep.subr.bf16.mxu1 %v471_v9  ;;  %225 = vmatprep.subr.bf16.mxu0 %v471_v9  ;;  %v476_v33 = vld [vmem:[%s735_s3 + $0x60] ss:$8 sps:$4 sm:$0xff]   ;;  %v477_v34 = vld [vmem:[%s735_s3 + $0x54] ss:$8 sps:$4 sm:$0xff]   ;;  %v479_v35 = vld [vmem:[%s735_s3 + $0x50] ss:$8 sps:$4 sm:$0xff]  }
   0x4   :  { %37 = vadd.xlane.f32.xlu0 %v451_v2  ;;  %33 = vadd.xlane.f32.xlu1 %v447_v3  ;;  %v480_v36 = vld [vmem:[%s735_s3 + $0x44] ss:$8 sps:$4 sm:$0xff]   ;;  %v482_v37 = vld [vmem:[%s735_s3 + $0x40] ss:$8 sps:$4 sm:$0xff]   ;;  %v483_v38 = vld [vmem:[%s735_s3 + $0x34] ss:$8 sps:$4 sm:$0xff]  }
   0x5   :  { %v42_v8 = vsel %vm41_vm0, %v30_v7, 0.0  ;;  %462 = vmatpush1.bf16.msra.mxu1 %v473_v10  ;;  %226 = vmatpush1.bf16.msra.mxu0 %v473_v10  ;;  %v485_v39 = vld [vmem:[%s735_s3 + $0x30] ss:$8 sps:$4 sm:$0xff]   ;;  %v486_v40 = vld [vmem:[%s735_s3 + $0x24] ss:$8 sps:$4 sm:$0xff]  }
   0x6   :  { %455 = vmatprep.subr.bf16.mxu1 %v474_v32  ;;  %227 = vmatprep.subr.bf16.mxu0 %v474_v32  ;;  %v488_v41 = vld [vmem:[%s735_s3 + $0x20] ss:$8 sps:$4 sm:$0xff]   ;;  %v489_v42 = vld [vmem:[%s735_s3 + $0x14] ss:$8 sps:$4 sm:$0xff]   ;;  %v491_v44 = vld [vmem:[%s735_s3 + $0x10] ss:$8 sps:$4 sm:$0xff]  }
   0x7   :  { %v492_v45 = vld [vmem:[%s735_s3 + $0x4] ss:$8 sps:$4 sm:$0xff]   ;;  %v494_v46 = vld [vmem:[%s735_s3] ss:$8 sps:$4 sm:$0xff]  }
   0x8   :  { %39 = vadd.xlane.f32.xlu0 %v452_v5  ;;  %35 = vadd.xlane.f32.xlu1 %v448_v6  ;;  %v417_v0 = vld [vmem:[%s736_s1] ss:$0 sm:$0xff] }
   0x9   :  { %463 = vmatpush1.bf16.msra.mxu1 %v476_v33  ;;  %228 = vmatpush1.bf16.msra.mxu0 %v476_v33 }
   0xa   :  { %456 = vmatprep.subr.bf16.mxu1 %v477_v34  ;;  %229 = vmatprep.subr.bf16.mxu0 %v477_v34 }
   0xc   :  { %43 = vadd.xlane.f32.xlu0 %v42_v8 }
   0xd   :  { %464 = vmatpush1.bf16.msra.mxu1 %v479_v35  ;;  %230 = vmatpush1.bf16.msra.mxu0 %v479_v35 }
   0xe   :  { %457 = vmatprep.subr.bf16.mxu1 %v480_v36  ;;  %231 = vmatprep.subr.bf16.mxu0 %v480_v36 }
  0x11   :  { %465 = vmatpush1.bf16.msra.mxu1 %v482_v37  ;;  %232 = vmatpush1.bf16.msra.mxu0 %v482_v37 }
  0x12   :  { %458 = vmatprep.subr.bf16.mxu1 %v483_v38  ;;  %233 = vmatprep.subr.bf16.mxu0 %v483_v38 }
  0x15   :  { %466 = vmatpush1.bf16.msra.mxu1 %v485_v39  ;;  %234 = vmatpush1.bf16.msra.mxu0 %v485_v39 }
  0x16   :  { %459 = vmatprep.subr.bf16.mxu1 %v486_v40  ;;  %235 = vmatprep.subr.bf16.mxu0 %v486_v40 }
  0x19   :  { %467 = vmatpush1.bf16.msra.mxu1 %v488_v41  ;;  %236 = vmatpush1.bf16.msra.mxu0 %v488_v41 }
  0x1a   :  { %460 = vmatprep.subr.bf16.mxu1 %v489_v42  ;;  %237 = vmatprep.subr.bf16.mxu0 %v489_v42 }
  0x1d   :  { %468 = vmatpush1.bf16.msra.mxu1 %v491_v44  ;;  %238 = vmatpush1.bf16.msra.mxu0 %v491_v44 }
  0x1e   :  { %461 = vmatprep.subr.bf16.mxu1 %v492_v45  ;;  %239 = vmatprep.subr.bf16.mxu0 %v492_v45 }
  0x21   :  { %469 = vmatpush1.bf16.msra.mxu1 %v494_v46  ;;  %240 = vmatpush1.bf16.msra.mxu0 %v494_v46 }
  0x8d   :  { %v38_v11 = vpop.xlane.xlu0 %37  ;;  %v34_v12 = vpop.xlane.xlu1 %33 }
  0x8e   :  { %v48_v13 = vmul.f32 0.0078125, %v38_v11  ;;  %v46_v14 = vmul.f32 0.0078125, %v34_v12 }
  0x90   :  { %v572_v15 = vsub.f32 %v451_v2, %v48_v13  ;;  %v574_v16 = vsub.f32 %v447_v3, %v46_v14 }
  0x91   :  { %v40_v17 = vpop.xlane.xlu0 %39  ;;  %v36_v18 = vpop.xlane.xlu1 %35 }
  0x92   :  { %v49_v19 = vmul.f32 0.0078125, %v40_v17  ;;  %v58_v20 = vmul.f32 %v572_v15, %v572_v15  ;;  %v47_v21 = vmul.f32 0.0078125, %v36_v18  ;;  %v56_v24 = vmul.f32 %v574_v16, %v574_v16 }
  0x94   :  { %v578_v22 = vsub.f32 %v452_v5, %v49_v19  ;;  %65 = vadd.xlane.f32.xlu1 %v58_v20  ;;  %v580_v23 = vsub.f32 %v448_v6, %v47_v21  ;;  %v418_v5 = vld [vmem:[%s737_s2] ss:$0 sm:$0xff] }
  0x95   :  { %v44_v25 = vpop.xlane.xlu0 %43 }
  0x96   :  { %v50_v26 = vmul.f32 0.0078125, %v44_v25  ;;  %v59_v27 = vmul.f32 %v578_v22, %v578_v22  ;;  %v57_v29 = vmul.f32 %v580_v23, %v580_v23 }
  0x98   :  { %v586_v28 = vsub.f32 %v30_v7, %v50_v26  ;;  %67 = vadd.xlane.f32.xlu0 %v59_v27  ;;  %61 = vadd.xlane.f32.xlu1 %v56_v24  ;;  %v135_v24 = vlaneseq }
  0x9a   :  { %v60_v30 = vmul.f32 %v586_v28, %v586_v28  ;;  %v136_v25 = vshrl.u32 %v135_v24, 7 }
  0x9c   :  { %63 = vadd.xlane.f32.xlu0 %v57_v29  ;;  %v69_v31 = vsel %vm41_vm0, %v60_v30, 0.0  ;;  %v137_v26 = vsub.s32 0, %v136_v25  ;;  %v141_v27 = vsub.s32 1, %v136_v25 }
  0x9d   :  { %70 = vadd.xlane.f32.xlu1 %v69_v31 }
 0x11d   :  { %v66_v47 = vpop.xlane.xlu1 %65 }
 0x11e   :  { %v74_v48 = vmul.f32 0.0078125, %v66_v47 }
 0x120   :  { %v79_v49 = vadd.f32 1e-05, %v74_v48 }
 0x121   :  { %v68_v50 = vpop.xlane.xlu0 %67  ;;  %v62_v51 = vpop.xlane.xlu1 %61 }
 0x122   :  { %495 = vrsqrt.f32 %v79_v49  ;;  %v75_v52 = vmul.f32 0.0078125, %v68_v50  ;;  %v72_v53 = vmul.f32 0.0078125, %v62_v51 }
 0x124   :  { %v80_v54 = vadd.f32 1e-05, %v75_v52  ;;  %v77_v55 = vadd.f32 1e-05, %v72_v53 }
 0x125   :  { %v64_v56 = vpop.xlane.xlu0 %63 }
 0x126   :  { %497 = vrsqrt.f32 %v80_v54  ;;  %v73_v57 = vmul.f32 0.0078125, %v64_v56  ;;  %v71_v58 = vpop.xlane.xlu1 %70 }
 0x127   :  { %499 = vrsqrt.f32 %v77_v55  ;;  %v76_v59 = vmul.f32 0.0078125, %v71_v58 }
 0x128   :  { %v78_v60 = vadd.f32 1e-05, %v73_v57 }
 0x129   :  { %v81_v61 = vadd.f32 1e-05, %v76_v59 }
 0x12a   :  { %501 = vrsqrt.f32 %v78_v60 }
 0x12b   :  { %503 = vrsqrt.f32 %v81_v61 }
 0x12f   :  { %v496_v62 = vpop.eup %495 }
 0x130   :  { %v89_v63 = vmul.f32 %v496_v62, %v572_v15 }
 0x132   :  { %v100_v4 = vmul.f32 %v417_v0, %v89_v63 }
 0x133   :  { %v498_v1 = vpop.eup %497 }
 0x134   :  { %v500_v2 = vpop.eup %499  ;;  %v90_v3 = vmul.f32 %v498_v1, %v578_v22  ;;  %v111_v10 = vadd.f32 %v418_v5, %v100_v4 }
 0x135   :  { %v87_v6 = vmul.f32 %v500_v2, %v574_v16 }
 0x136   :  { %v101_v7 = vmul.f32 %v417_v0, %v90_v3 }
 0x137   :  { %v502_v8 = vpop.eup %501  ;;  %v98_v13 = vmul.f32 %v417_v0, %v87_v6 }
 0x138   :  { %v504_v9 = vpop.eup %503  ;;  %v112_v11 = vadd.f32 %v418_v5, %v101_v7  ;;  %v88_v12 = vmul.f32 %v502_v8, %v580_v23  ;;  %v133_v23 = vld [vmem:[%s738_s4] sm:$0x3] }
 0x139   :  { %v91_v14 = vmul.f32 %v504_v9, %v586_v28  ;;  %v109_v19 = vadd.f32 %v418_v5, %v98_v13  ;;  %v138_v28 = vrot.slane %v133_v23, %v137_v26  ;;  %v142_v29 = vrot.slane %v133_v23, %v141_v27 }
 0x13a   :  { %v115_v15 = vpack.c.bf16 %v112_v11, %v111_v10  ;;  %v99_v17 = vmul.f32 %v417_v0, %v88_v12 }
 0x13b   :  { %v102_v18 = vmul.f32 %v417_v0, %v91_v14 }
 0x13c   :  { %268 = vmatmul.mubr.bf16.vlgmr.msra.gmra.mxu1 %v115_v15  ;;  %v110_v20 = vadd.f32 %v418_v5, %v99_v17 }
 0x13d   :  { %277 = vmatprep.mubr.bf16.mxu1 %v525_v43  ;;  %v113_v22 = vadd.f32 %v418_v5, %v102_v18 }
 0x13e   :  { %v114_v21 = vpack.c.bf16 %v110_v20, %v109_v19 }
 0x13f   :  { %v116_v16 = vpack.c.bf16 %v113_v22, %v113_v22 }
 0x140   :  { %258 = vmatmul.mubr.bf16.vlgmr.msra.gmra.mxu0 %v114_v21 }
 0x144   :  { %278 = vmatmul.mubr.bf16.gmra.mxu1 %v116_v16 }
 0x1fc   :  { %v269_v30 = vpop.f32.mrf.mxu1 }
 0x1fd   :  { %v649_v31 = vadd.f32 %v269_v30, %v138_v28 }
 0x1fe   :  { %v271_v32 = vpop.f32.mrf.mxu1 }
 0x1ff   :  { %v290_v33 = vmul.f32 %v649_v31, %v649_v31  ;;  %v653_v34 = vadd.f32 %v271_v32, %v142_v29 }
 0x200   :  { %v259_v35 = vpop.f32.mrf.mxu0  ;;  %v273_v36 = vpop.f32.mrf.mxu1 }
 0x201   :  { %v300_v37 = vmul.f32 %v290_v33, %v649_v31  ;;  %v291_v38 = vmul.f32 %v653_v34, %v653_v34  ;;  %v658_v39 = vadd.f32 %v259_v35, %v138_v28  ;;  %v660_v40 = vadd.f32 %v273_v36, %v138_v28 }
 0x202   :  { %v261_v41 = vpop.f32.mrf.mxu0  ;;  %v275_v42 = vpop.f32.mrf.mxu1 }
 0x203   :  { %v310_v43 = vmul.f32 0.044715, %v300_v37  ;;  %v301_v44 = vmul.f32 %v291_v38, %v653_v34  ;;  %v286_v45 = vmul.f32 %v658_v39, %v658_v39  ;;  %v292_v46 = vmul.f32 %v660_v40, %v660_v40 }
 0x204   :  { %v667_v47 = vadd.f32 %v261_v41, %v142_v29  ;;  %v669_v48 = vadd.f32 %v275_v42, %v142_v29  ;;  %v263_v49 = vpop.f32.mrf.mxu0  ;;  %v279_v50 = vpop.f32.mrf.mxu1 }
 0x205   :  { %v320_v51 = vadd.f32 %v310_v43, %v649_v31  ;;  %v311_v52 = vmul.f32 0.044715, %v301_v44  ;;  %v296_v53 = vmul.f32 %v286_v45, %v658_v39  ;;  %v302_v54 = vmul.f32 %v292_v46, %v660_v40 }
 0x206   :  { %v287_v55 = vmul.f32 %v667_v47, %v667_v47  ;;  %v293_v56 = vmul.f32 %v669_v48, %v669_v48  ;;  %v678_v57 = vadd.f32 %v263_v49, %v138_v28  ;;  %v680_v58 = vadd.f32 %v279_v50, %v138_v28  ;;  %v281_v59 = vpop.f32.mrf.mxu1  ;;  %v265_v4 = vpop.f32.mrf.mxu0 }
 0x207   :  { %v330_v60 = vmul.f32 0.7978846, %v320_v51  ;;  %v321_v61 = vadd.f32 %v311_v52, %v653_v34  ;;  %v306_v62 = vmul.f32 0.044715, %v296_v53  ;;  %v312_v63 = vmul.f32 0.044715, %v302_v54 }
 0x208   :  { %v297_v0 = vmul.f32 %v287_v55, %v667_v47  ;;  %v303_v1 = vmul.f32 %v293_v56, %v669_v48  ;;  %v288_v2 = vmul.f32 %v678_v57, %v678_v57  ;;  %v294_v3 = vmul.f32 %v680_v58, %v680_v58  ;;  %v283_v5 = vpop.f32.mrf.mxu1 }
 0x209   :  { %505 = vtanh.f32 %v330_v60  ;;  %v331_v6 = vmul.f32 0.7978846, %v321_v61  ;;  %v316_v7 = vadd.f32 %v306_v62, %v658_v39  ;;  %v322_v8 = vadd.f32 %v312_v63, %v660_v40 }
 0x20a   :  { %v307_v9 = vmul.f32 0.044715, %v297_v0  ;;  %v313_v10 = vmul.f32 0.044715, %v303_v1  ;;  %v298_v11 = vmul.f32 %v288_v2, %v678_v57  ;;  %v304_v12 = vmul.f32 %v294_v3, %v680_v58  ;;  %v284_v13 = vpop.f32.mrf.mxu1 }
 0x20b   :  { %507 = vtanh.f32 %v331_v6  ;;  %v326_v14 = vmul.f32 0.7978846, %v316_v7  ;;  %v332_v15 = vmul.f32 0.7978846, %v322_v8  ;;  %v693_v17 = vadd.f32 %v265_v4, %v142_v29 }
 0x20c   :  { %v317_v18 = vadd.f32 %v307_v9, %v667_v47  ;;  %v323_v19 = vadd.f32 %v313_v10, %v669_v48  ;;  %v308_v20 = vmul.f32 0.044715, %v298_v11  ;;  %v314_v21 = vmul.f32 0.044715, %v304_v12 }
 0x20d   :  { %509 = vtanh.f32 %v326_v14  ;;  %v289_v22 = vmul.f32 %v693_v17, %v693_v17  ;;  %v699_v16 = vadd.f32 %v281_v59, %v142_v29 }
 0x20e   :  { %511 = vtanh.f32 %v332_v15  ;;  %v327_v24 = vmul.f32 0.7978846, %v317_v18  ;;  %v333_v25 = vmul.f32 0.7978846, %v323_v19  ;;  %v318_v26 = vadd.f32 %v308_v20, %v678_v57 }
 0x20f   :  { %v324_v23 = vadd.f32 %v314_v21, %v680_v58  ;;  %v299_v27 = vmul.f32 %v289_v22, %v693_v17  ;;  %v295_v28 = vmul.f32 %v699_v16, %v699_v16 }
 0x210   :  { %513 = vtanh.f32 %v327_v24  ;;  %v328_v30 = vmul.f32 0.7978846, %v318_v26 }
 0x211   :  { %515 = vtanh.f32 %v333_v25  ;;  %v334_v32 = vmul.f32 0.7978846, %v324_v23  ;;  %v309_v33 = vmul.f32 0.044715, %v299_v27  ;;  %v305_v29 = vmul.f32 %v295_v28, %v699_v16 }
 0x212   :  { %517 = vtanh.f32 %v328_v30 }
 0x213   :  { %519 = vtanh.f32 %v334_v32  ;;  %v319_v35 = vadd.f32 %v309_v33, %v693_v17  ;;  %v315_v36 = vmul.f32 0.044715, %v305_v29 }
 0x215   :  { %v329_v37 = vmul.f32 0.7978846, %v319_v35  ;;  %v325_v38 = vadd.f32 %v315_v36, %v699_v16 }
 0x216   :  { %v506_v41 = vpop.eup %505 }
 0x217   :  { %v350_v42 = vadd.f32 1.0, %v506_v41  ;;  %521 = vtanh.f32 %v329_v37  ;;  %v335_v43 = vmul.f32 0.7978846, %v325_v38 }
 0x218   :  { %v508_v44 = vpop.eup %507 }
 0x219   :  { %v360_v45 = vmul.f32 0.5, %v350_v42  ;;  %v351_v46 = vadd.f32 1.0, %v508_v44  ;;  %523 = vtanh.f32 %v335_v43 }
 0x21a   :  { %v510_v49 = vpop.eup %509 }
 0x21b   :  { %v512_v50 = vpop.eup %511  ;;  %v361_v51 = vmul.f32 0.5, %v351_v46  ;;  %v346_v52 = vadd.f32 1.0, %v510_v49  ;;  %v370_v55 = vmul.f32 %v360_v45, %v649_v31 }
 0x21c   :  { %v352_v53 = vadd.f32 1.0, %v512_v50 }
 0x21d   :  { %v514_v54 = vpop.eup %513  ;;  %v371_v56 = vmul.f32 %v361_v51, %v653_v34  ;;  %v356_v60 = vmul.f32 0.5, %v346_v52 }
 0x21e   :  { %v516_v59 = vpop.eup %515  ;;  %v347_v61 = vadd.f32 1.0, %v514_v54  ;;  %v362_v0 = vmul.f32 0.5, %v352_v53 }
 0x21f   :  { %v518_v62 = vpop.eup %517  ;;  %v442_v63 = vpack.c.bf16 %v371_v56, %v370_v55  ;;  %v353_v1 = vadd.f32 1.0, %v516_v59  ;;  %v366_v6 = vmul.f32 %v356_v60, %v658_v39 }
 0x220   :  { %v520_v2 = vpop.eup %519  ;;  %v357_v3 = vmul.f32 0.5, %v347_v61  ;;  %v348_v5 = vadd.f32 1.0, %v518_v62  ;;  %v372_v34 = vmul.f32 %v362_v0, %v660_v40 }
 0x221   :  { %410 = vst [vmem:[%s739_s5 + $0x10] sm:$0xff] %v442_v63  ;;  %v363_v4 = vmul.f32 0.5, %v353_v1  ;;  %v354_v8 = vadd.f32 1.0, %v520_v2 }
 0x222   :  { %v367_v31 = vmul.f32 %v357_v3, %v667_v47  ;;  %v358_v12 = vmul.f32 0.5, %v348_v5 }
 0x223   :  { %v373_v7 = vmul.f32 %v363_v4, %v669_v48  ;;  %v364_v39 = vmul.f32 0.5, %v354_v8 }
 0x224   :  { %v522_v9 = vpop.eup %521  ;;  %v440_v10 = vpack.c.bf16 %v367_v31, %v366_v6  ;;  %v368_v48 = vmul.f32 %v358_v12, %v678_v57 }
 0x225   :  { %v443_v11 = vpack.c.bf16 %v373_v7, %v372_v34  ;;  %v349_v13 = vadd.f32 1.0, %v522_v9  ;;  %v374_v19 = vmul.f32 %v364_v39, %v680_v58 }
 0x226   :  { %v524_v14 = vpop.eup %523  ;;  %408 = vst [vmem:[%s739_s5] sm:$0xff] %v440_v10 }
 0x227   :  { %411 = vst [vmem:[%s739_s5 + $0x18] sm:$0xff] %v443_v11  ;;  %v359_v47 = vmul.f32 0.5, %v349_v13  ;;  %v355_v40 = vadd.f32 1.0, %v524_v14 }
 0x229   :  { %v369_v15 = vmul.f32 %v359_v47, %v693_v17  ;;  %v365_v18 = vmul.f32 0.5, %v355_v40 }
 0x22b   :  { %v441_v20 = vpack.c.bf16 %v369_v15, %v368_v48  ;;  %v375_v21 = vmul.f32 %v365_v18, %v699_v16 }
 0x22d   :  { %409 = vst [vmem:[%s739_s5 + $0x8] sm:$0xff] %v441_v20  ;;  %v444_v22 = vpack.c.bf16 %v375_v21, %v374_v19 }
 0x22f   :  { %412 = vst [vmem:[%s739_s5 + $0x20] sm:$0x11] %v444_v22 }

// kernel: vit_forward.12
= control target key start
LH: loop header
LB: loop body
LE: loop exit
PB: predicated region body
PF: predicated region fallthrough
CT: control target
= control target key end

     0   :  { %s2003_s21 = smov 0   ;;  %s2005_s22 = smov 0   ;;  %s2269_s0 = inlined_call_operand.vmem [shape: bf16[2,17,384], index: 0, kind: input, shape index: {}, may-alias: {0,1,2}]   ;;  %s2270_s1 = inlined_call_operand.vmem [shape: bf16[2,17,384], index: 1, kind: input, shape index: {}, may-alias: {0,1,2}]   ;;  %s2271_s2 = inlined_call_operand.vmem [shape: bf16[2,17,384], index: 2, kind: input, shape index: {}, may-alias: {0,1,2}]   ;;  %s2272_s3 = inlined_call_operand.vmem [shape: bf16[128,128], index: 3, kind: input, shape index: {}]   ;;  %s2273_s4 = inlined_call_operand.vmem [shape: f32[1,128], index: 4, kind: input, shape index: {}]   ;;  %s2274_s5 = inlined_call_operand.vmem [shape: bf16[2,17,128], index: 5, kind: input, shape index: {}]   ;;  %s2275_s6 = inlined_call_operand.vmem [shape: bf16[2,17,128], index: 6, kind: output, shape index: {}]  }
   0x1   :  { %s2007_s23 = smov 0  }
   0x2 LB: > { %s1620_s24 = sadd.s32 4294967295, %s1962_s23   ;;  %s2020_s25 = sadd.s32 1, %s1962_s23   ;;  %s1962_s23 = sphi %s2007_s23, %s2279_s23   ;;  %s1958_s22 = sphi %s2005_s22, %s2278_s22   ;;  %s1954_s21 = sphi %s2003_s21, %s2277_s21  }
   0x3   : > { %s20_s26 = ssub.s32 %s1962_s23, %s2020_s25  ;;  %s23_s27 = sadd.s32 1, %s1958_s22 }
   0x4   : > { %p21_p0 = scmp.eq.s32.totalorder %s20_s26, 0  ;;  %p30_p1 = scmp.ne.s32.totalorder %s1958_s22, %s1954_s21 }
   0x5   : > { %p31_p2 = scmp.eq.s32.totalorder %s1962_s23, 0  ;;  %p1623_p4 = scmp.ge.s32.totalorder %s1962_s23, 2 }
   0x6   : > { %s2029_s28 = scalar_select %p21_p0, %s1958_s22, %s23_s27  }
   0x7   : > { %p2031_p3 = por %p31_p2, %p30_p1  ;;  %208 = sbr.rel (%p1623_p4) target bundleno = 33 (0x21), region = 24 }
   0xc   : > { %211 = sbr.rel (!%p2031_p3) target bundleno = 19 (0x13), region = 28  ;;  %s213_s30 = sand.u32 (%p2031_p3), 1, %s1958_s22  }
   0xd   : > { %s1845_s7 = smul.u32 (%p2031_p3), 36, %s1962_s23 }
   0xe   : > { %s1844_s8 = smul.u32 (%p2031_p3), 12, %s213_s30 }
   0xf   : > { %s218_s11 = scalar_lea.vmem (%p2031_p3), %s2269_s0, %s1845_s7 }
  0x10   : > { %v235_v0 = vld [vmem:[%s218_s11] sm:$0xf] (%p2031_p3)  ;;  %v237_v1 = vld [vmem:[%s218_s11 + $0xc] sm:$0xf] (%p2031_p3)  ;;  %s215_s12 = scalar_lea.vmem (%p2031_p3), [#allocation2], %s1844_s8 }
  0x11   : > { %236 = vst [vmem:[%s215_s12] sm:$0xf] %v235_v0  ;;  %238 = vst [vmem:[%s215_s12 + $0x4] sm:$0xf] %v237_v1  ;;  %v239_v2 = vld [vmem:[%s218_s11 + $0x18] sm:$0xf] }
  0x12   : > { %240 = vst [vmem:[%s215_s12 + $0x8] sm:$0xf] %v239_v2 }
  0x13 PF: > { %270 = sbr.rel (!%p2031_p3) target bundleno = 26 (0x1a), region = 69  ;;  %s272_s13 = sand.u32 (%p2031_p3), 1, %s1958_s22  }
  0x14   : > { %s1625_s14 = smul.u32 (%p2031_p3), 36, %s1962_s23 }
  0x15   : > { %s1846_s15 = smul.u32 (%p2031_p3), 12, %s272_s13 }
  0x16   : > { %s1536_s18 = scalar_lea.vmem (%p2031_p3), %s2270_s1, %s1625_s14 }
  0x17   : > { %v1626_v3 = vld [vmem:[%s1536_s18 + $0x4] sm:$0xf] (%p2031_p3)  ;;  %v1627_v4 = vld [vmem:[%s1536_s18 + $0x10] sm:$0xf] (%p2031_p3)  ;;  %s274_s19 = scalar_lea.vmem (%p2031_p3), [#allocation3], %s1846_s15 }
  0x18   : > { %296 = vst [vmem:[%s274_s19] sm:$0xf] %v1626_v3  ;;  %298 = vst [vmem:[%s274_s19 + $0x4] sm:$0xf] %v1627_v4  ;;  %v1628_v5 = vld [vmem:[%s1536_s18 + $0x1c] sm:$0xf] }
  0x19   : > { %300 = vst [vmem:[%s274_s19 + $0x8] sm:$0xf] %v1628_v5 }
  0x1a PF: > { %330 = sbr.rel (!%p2031_p3) target bundleno = 33 (0x21), region = 110  ;;  %s332_s20 = sand.u32 (%p2031_p3), 1, %s1958_s22  }
  0x1b   : > { %s1629_s26 = smul.u32 (%p2031_p3), 36, %s1962_s23 }
  0x1c   : > { %s1847_s27 = smul.u32 (%p2031_p3), 12, %s332_s20 }
  0x1d   : > { %s1542_s8 = scalar_lea.vmem (%p2031_p3), %s2271_s2, %s1629_s26 }
  0x1e   : > { %v1630_v6 = vld [vmem:[%s1542_s8 + $0x8] sm:$0xf] (%p2031_p3)  ;;  %v1631_v7 = vld [vmem:[%s1542_s8 + $0x14] sm:$0xf] (%p2031_p3)  ;;  %s334_s9 = scalar_lea.vmem (%p2031_p3), [#allocation4], %s1847_s27 }
  0x1f   : > { %356 = vst [vmem:[%s334_s9] sm:$0xf] %v1630_v6  ;;  %358 = vst [vmem:[%s334_s9 + $0x4] sm:$0xf] %v1631_v7  ;;  %v1632_v8 = vld [vmem:[%s1542_s8 + $0x20] sm:$0xf] }
  0x20   : > { %360 = vst [vmem:[%s334_s9 + $0x8] sm:$0xf] %v1632_v8 }
  0x21 PF: > { %p1633_p5 = scmp.ge.s32.totalorder %s1962_s23, 1  ;;  %p397_p6 = scmp.lt.s32.totalorder %s1962_s23, 3 }
  0x23   : > { %p398_p7 = pnand %p1633_p5, %p397_p6 }
  0x24   : > { %s404_s29 = sand.u32 (!%p398_p7), 1, %s1954_s21   ;;  %s1964_s21 = smov (!%p398_p7), 96  }
  0x25   : > { %401 = sbr.rel (%p398_p7) target bundleno = 1726 (0x6be), region = 155  ;;  %s1965_s13 = smov (!%p398_p7), 64  }
  0x26   : > { %s2060_s10 = smul.u32 (!%p398_p7), 12, %s404_s29  ;;  %s1967_s19 = smov (!%p398_p7), 32  }
  0x27   : > { %p460_p8 = scmp.lt.s32.totalorder (!%p398_p7), %s1620_s24, 1 }
  0x28   : > { %s413_s11 = scalar_lea.vmem (!%p398_p7), [#allocation3], %s2060_s10  ;;  %s406_s12 = scalar_lea.vmem (!%p398_p7), [#allocation2], %s2060_s10 }
  0x29   : > { %s420_s14 = scalar_lea.vmem (!%p398_p7), [#allocation4], %s2060_s10 }
  0x2a   : > { %vm512_vm0 = vcmask 261120   ;;  %v2063_v9 = vld [vmem:[%s413_s11 + $0x8] ss:$0 sps:$4 sm:$0x11]   ;;  %v2065_v10 = vld [vmem:[%s413_s11] sm:$0xff]   ;;  %vm576_vm1 = vcmask 138240  }
  0x2b   : > { %1836 = vmatprep.subr.msk.bf16.mxu0 %vm512_vm0, %v2063_v9  ;;  %v523_v11 = vsel %vm512_vm0, %v2063_v9, 0  ;;  %v2072_v12 = vld [vmem:[%s406_s12] sm:$0xff]   ;;  %763 = vrot.lane.b32.xlu0 %v2063_v9, %s1964_s21  ;;  %v2084_v13 = vld [vmem:[%s406_s12 + $0x8] ss:$0 sps:$4 sm:$0x11]   ;;  %v520_v14 = vsel %vm512_vm0, %v2065_v10, 0 }
  0x2c   : > { %1741 = vmatpush3.bf16.xpose.msra.mxu0 %v523_v11  ;;  %1744 = vmatprep.mubr.msk.bf16.mxu0 %vm512_vm0, %v2072_v12  ;;  %vm583_vm2 = vcmask 131072   ;;  %v2107_v49 = vld [vmem:[%s420_s14 + $0x8] ss:$0 sps:$4 sm:$0x11]   ;;  %vm628_vm3 = vcmask 1040384   ;;  %v1966_v50 = vmov 0  }
  0x2d   : > { %1837 = vmatprep.subr.msk.bf16.mxu0 %vm512_vm0, %v2065_v10  ;;  %757 = vrot.lane.b32.xlu1 %v2072_v12, %s1964_s21  ;;  %v2110_v51 = vsel %vm628_vm3, 65535, %v1966_v50  ;;  %v2118_v53 = vld [vmem:[%s420_s14] sm:$0xff]   ;;  %s2281_s24 = smov (!%p460_p8, %s1620_s24), 1  ;;  %vm1502_vm4 = vsmask.f32 256 }
  0x2e   : > { %v632_v52 = vand.u32 %v2107_v49, %v2110_v51  ;;  %s1849_s10 = smul.u32 12, %s2281_s24  ;;  %vm1503_vm5 = vmand %vm628_vm3, %vm1502_vm4 }
  0x2f   : > { %761 = vrot.lane.b32.xlu0 %v2065_v10, %s1964_s21 }
  0x30   : > { %1748 = vmatprep.subr.bf16.mxu1 %v632_v52  ;;  %s469_s20 = scalar_lea.vmem %s2275_s6, %s1849_s10 }
  0x31   : > { %759 = vrot.lane.b32.xlu1 %v2084_v13, %s1964_s21  ;;  %1749 = vmatpush3.bf16.msra.mxu1 %v632_v52 }
  0x32   : > { %1750 = vmatprep.subr.bf16.mxu1 %v2118_v53 }
  0x34   : > { %1743 = vmatpush3.bf16.xpose.msra.mxu0 %v520_v14 }
  0x35   : > { %1751 = vmatpush3.bf16.msra.mxu1 %v2118_v53 }
  0x3b   : > { %1745 = vmatmul.mubr.msk.bf16.vlgmr.msra.gmra.mxu0 %vm512_vm0, %v2084_v13 }
  0x9d   : > { %v764_v15 = vpop.permute.xlu0 %763 }
  0x9e   : > { %v775_v16 = vsel %vm512_vm0, %v764_v15, 0  ;;  %1838 = vmatprep.subr.msk.bf16.mxu0 %vm512_vm0, %v764_v15 }
  0x9f   : > { %1765 = vmatpush3.bf16.xpose.msra.mxu0 %v775_v16  ;;  %v758_v17 = vpop.permute.xlu1 %757 }
  0xa0   : > { %1768 = vmatprep.mubr.msk.bf16.mxu0 %vm512_vm0, %v758_v17 }
  0xa1   : > { %v762_v18 = vpop.permute.xlu0 %761 }
  0xa2   : > { %1839 = vmatprep.subr.msk.bf16.mxu0 %vm512_vm0, %v762_v18  ;;  %v772_v19 = vsel %vm512_vm0, %v762_v18, 0 }
  0xa3   : > { %v760_v20 = vpop.permute.xlu1 %759 }
  0xa7   : > { %1767 = vmatpush3.bf16.xpose.msra.mxu0 %v772_v19 }
  0xae   : > { %1769 = vmatmul.mubr.msk.bf16.vlgmr.msra.gmra.mxu0 %vm512_vm0, %v760_v20 }
  0xfb   : > { %v1746_v21 = vpop.f32.mrf.mxu0 }
  0xfc   : > { %v575_v25 = vmul.f32 0.17677669, %v1746_v21 }
  0xfd   : > { %v559_v22 = vpop.f32.mrf.mxu0 }
  0xfe   : > { %v573_v23 = vmul.f32 0.17677669, %v559_v22  ;;  %v584_v29 = vsel %vm583_vm2, %v575_v25, -inf }
  0xff   : > { %v1747_v24 = vpop.f32.mrf.mxu0 }
 0x100   : > { %v577_v26 = vsel %vm576_vm1, %v573_v23, -inf }
 0x101   : > { %578 = vmax.xlane.f32.xlu0 %v577_v26  ;;  %v562_v27 = vpop.f32.mrf.mxu0 }
 0x102   : > { %v574_v28 = vmul.f32 0.17677669, %v562_v27 }
 0x104   : > { %v580_v30 = vsel %vm576_vm1, %v574_v28, -inf }
 0x105   : > { %585 = vmax.xlane.f32.xlu0 %v584_v29  ;;  %581 = vmax.xlane.f32.xlu1 %v580_v30 }
 0x16e   : > { %v1770_v31 = vpop.f32.mrf.mxu0 }
 0x16f   : > { %v827_v56 = vmul.f32 0.17677669, %v1770_v31 }
 0x170   : > { %v811_v32 = vpop.f32.mrf.mxu0 }
 0x171   : > { %v825_v54 = vmul.f32 0.17677669, %v811_v32  ;;  %v834_v58 = vsel %vm583_vm2, %v827_v56, -inf }
 0x172   : > { %v1771_v33 = vpop.f32.mrf.mxu0 }
 0x173   : > { %v828_v55 = vsel %vm576_vm1, %v825_v54, -inf  ;;  %v1884_v33 = vld [vmem:[%s2272_s3 + $0x8] sm:$0xff]  }
 0x174   : > { %v814_v57 = vpop.f32.mrf.mxu0  ;;  %1756 = vmatprep.subr.bf16.mxu1 %v1884_v33 }
 0x175   : > { %v826_v59 = vmul.f32 0.17677669, %v814_v57 }
 0x177   : > { %v831_v60 = vsel %vm576_vm1, %v826_v59, -inf }
 0x18a   : > { %v579_v34 = vpop.xlane.xlu0 %578 }
 0x18b   : > { %v587_v35 = vsub.f32 %v573_v23, %v579_v34  ;;  %v1885_v34 = vld [vmem:[%s2272_s3] sm:$0xff]  }
 0x18d   : > { %v590_v36 = vmul.f32 1.442695, %v587_v35 }
 0x18e   : > { %v586_v37 = vpop.xlane.xlu0 %585  ;;  %v582_v38 = vpop.xlane.xlu1 %581 }
 0x18f   : > { %1892 = vpow2.f32 %v590_v36  ;;  %v589_v39 = vsub.f32 %v575_v25, %v586_v37  ;;  %v588_v40 = vsub.f32 %v574_v28, %v582_v38 }
 0x191   : > { %v594_v41 = vmul.f32 1.442695, %v589_v39  ;;  %v592_v42 = vmul.f32 1.442695, %v588_v40 }
 0x193   : > { %1894 = vpow2.f32 %v594_v41 }
 0x194   : > { %1896 = vpow2.f32 %v592_v42 }
 0x19c   : > { %v1893_v43 = vpop.eup %1892 }
 0x19d   : > { %v596_v44 = vsel %vm576_vm1, %v1893_v43, 0.0 }
 0x19e   : > { %597 = vadd.xlane.f32.xlu0 %v596_v44 }
 0x1a0   : > { %v1895_v45 = vpop.eup %1894 }
 0x1a1   : > { %v1897_v46 = vpop.eup %1896  ;;  %v602_v47 = vsel %vm583_vm2, %v1895_v45, 0.0 }
 0x1a2   : > { %603 = vadd.xlane.f32.xlu0 %v602_v47  ;;  %v599_v48 = vsel %vm576_vm1, %v1897_v46, 0.0 }
 0x1a3   : > { %600 = vadd.xlane.f32.xlu1 %v599_v48 }
 0x1b4   : > { %1006 = vrot.lane.b32.xlu1 %v2063_v9, %s1965_s13 }
 0x1b8   : > { %1000 = vrot.lane.b32.xlu1 %v2072_v12, %s1965_s13  ;;  %1004 = vrot.lane.b32.xlu0 %v2065_v10, %s1965_s13 }
 0x1bc   : > { %1002 = vrot.lane.b32.xlu1 %v2084_v13, %s1965_s13 }
 0x1d7   : > { %829 = vmax.xlane.f32.xlu0 %v828_v55 }
 0x1db   : > { %835 = vmax.xlane.f32.xlu0 %v834_v58 }
 0x1e0   : > { %832 = vmax.xlane.f32.xlu1 %v831_v60 }
 0x227   : > { %v598_v61 = vpop.xlane.xlu0 %597 }
 0x228   : > { %1898 = vrcp.f32 %v598_v61 }
 0x22b   : > { %v604_v62 = vpop.xlane.xlu0 %603 }
 0x22c   : > { %1900 = vrcp.f32 %v604_v62  ;;  %v601_v63 = vpop.xlane.xlu1 %600 }
 0x22d   : > { %1902 = vrcp.f32 %v601_v63 }
 0x22f   : > { %v1005_v1 = vpop.permute.xlu0 %1004 }
 0x230   : > { %v1007_v0 = vpop.permute.xlu1 %1006  ;;  %v1015_v4 = vsel %vm512_vm0, %v1005_v1, 0 }
 0x231   : > { %v1018_v2 = vsel %vm512_vm0, %v1007_v0, 0  ;;  %1840 = vmatprep.subr.msk.bf16.mxu0 %vm512_vm0, %v1007_v0 }
 0x232   : > { %1789 = vmatpush3.bf16.xpose.msra.mxu0 %v1018_v2 }
 0x233   : > { %1841 = vmatprep.subr.msk.bf16.mxu0 %vm512_vm0, %v1005_v1 }
 0x234   : > { %v1001_v3 = vpop.permute.xlu1 %1000 }
 0x235   : > { %1792 = vmatprep.mubr.msk.bf16.mxu0 %vm512_vm0, %v1001_v3  ;;  %v1899_v5 = vpop.eup %1898 }
 0x236   : > { %v608_v11 = vmul.f32 %v1899_v5, %v1893_v43 }
 0x238   : > { %v1003_v17 = vpop.permute.xlu1 %1002 }
 0x239   : > { %v1901_v6 = vpop.eup %1900 }
 0x23a   : > { %v1903_v7 = vpop.eup %1902  ;;  %1791 = vmatpush3.bf16.xpose.msra.mxu0 %v1015_v4  ;;  %v610_v8 = vmul.f32 %v1901_v6, %v1895_v45  ;;  %v1886_v6 = vld [vmem:[%s2272_s3 + $0x18] sm:$0xff]  }
 0x23b   : > { %v609_v14 = vmul.f32 %v1903_v7, %v1897_v46  ;;  %v1887_v7 = vld [vmem:[%s2272_s3 + $0x10] sm:$0xff]  }
 0x23c   : > { %v612_v15 = vpack.c.bf16 %v610_v8, %v610_v8 }
 0x23d   : > { %v611_v16 = vpack.c.bf16 %v609_v14, %v608_v11 }
 0x23f   : > { %1752 = vmatprep.mubr.msk.bf16.mxu1 %vm576_vm1, %v611_v16 }
 0x240   : > { %1753 = vmatmul.mubr.msk.bf16.vlgmr.msra.gmra.mxu1 %vm576_vm1, %v612_v15 }
 0x241   : > { %1793 = vmatmul.mubr.msk.bf16.vlgmr.msra.gmra.mxu0 %vm512_vm0, %v1003_v17  ;;  %1757 = vmatpush3.bf16.msra.mxu1 %v1884_v33 }
 0x242   : > { %1758 = vmatprep.subr.bf16.mxu1 %v1885_v34 }
 0x245   : > { %1759 = vmatpush3.bf16.msra.mxu1 %v1885_v34 }
 0x260   : > { %v830_v18 = vpop.xlane.xlu0 %829 }
 0x261   : > { %v837_v19 = vsub.f32 %v825_v54, %v830_v18 }
 0x263   : > { %v840_v22 = vmul.f32 1.442695, %v837_v19 }
 0x264   : > { %v836_v20 = vpop.xlane.xlu0 %835 }
 0x265   : > { %v839_v21 = vsub.f32 %v827_v56, %v836_v20 }
 0x267   : > { %v844_v23 = vmul.f32 1.442695, %v839_v21 }
 0x269   : > { %1904 = vpow2.f32 %v844_v23  ;;  %v833_v24 = vpop.xlane.xlu1 %832 }
 0x26a   : > { %v838_v25 = vsub.f32 %v826_v59, %v833_v24  ;;  %1906 = vpow2.f32 %v840_v22 }
 0x26c   : > { %v842_v26 = vmul.f32 1.442695, %v838_v25 }
 0x26e   : > { %1908 = vpow2.f32 %v842_v26 }
 0x276   : > { %v2135_v27 = vpop.eup %1904 }
 0x277   : > { %v852_v28 = vsel %vm583_vm2, %v2135_v27, 0.0  ;;  %v2139_v29 = vpop.eup %1906 }
 0x278   : > { %853 = vadd.xlane.f32.xlu0 %v852_v28  ;;  %v846_v31 = vsel %vm576_vm1, %v2139_v29, 0.0 }
 0x27b   : > { %v2141_v30 = vpop.eup %1908 }
 0x27c   : > { %847 = vadd.xlane.f32.xlu0 %v846_v31  ;;  %v849_v32 = vsel %vm576_vm1, %v2141_v30, 0.0 }
 0x27d   : > { %850 = vadd.xlane.f32.xlu1 %v849_v32 }
 0x28e   : > { %865 = vrot.lane.b32.xlu1 %v2107_v49, %s1964_s21 }
 0x292   : > { %1249 = vrot.lane.b32.xlu1 %v2063_v9, %s1967_s19  ;;  %863 = vrot.lane.b32.xlu0 %v2118_v53, %s1964_s21  ;;  %s464_s21 = scalar_lea.vmem %s2274_s5, %s1849_s10 }
 0x296   : > { %1247 = vrot.lane.b32.xlu1 %v2065_v10, %s1967_s19  ;;  %1243 = vrot.lane.b32.xlu0 %v2072_v12, %s1967_s19 }
 0x29a   : > { %1245 = vrot.lane.b32.xlu1 %v2084_v13, %s1967_s19 }
 0x300   : > { %v1754_v35 = vpop.f32.mrf.mxu1 }
 0x301   : > { %v1794_v36 = vpop.f32.mrf.mxu0  ;;  %v854_v37 = vpop.xlane.xlu0 %853  ;;  %v683_v46 = vpack.c.bf16 %v1754_v35, %v1754_v35 }
 0x302   : > { %v668_v38 = vpop.f32.mrf.mxu1  ;;  %1910 = vrcp.f32 %v854_v37  ;;  %v1070_v43 = vmul.f32 0.17677669, %v1794_v36 }
 0x303   : > { %v1054_v39 = vpop.f32.mrf.mxu0 }
 0x304   : > { %v1068_v40 = vmul.f32 0.17677669, %v1054_v39  ;;  %v1755_v9 = vpop.f32.mrf.mxu1  ;;  %v1077_v52 = vsel %vm583_vm2, %v1070_v43, -inf }
 0x305   : > { %v1795_v41 = vpop.f32.mrf.mxu0  ;;  %v848_v42 = vpop.xlane.xlu0 %847 }
 0x306   : > { %1912 = vrcp.f32 %v848_v42  ;;  %v671_v44 = vpop.f32.mrf.mxu1  ;;  %v851_v10 = vpop.xlane.xlu1 %850  ;;  %v1071_v45 = vsel %vm576_vm1, %v1068_v40, -inf }
 0x307   : > { %v682_v12 = vpack.c.bf16 %v671_v44, %v668_v38  ;;  %1914 = vrcp.f32 %v851_v10  ;;  %1072 = vmax.xlane.f32.xlu0 %v1071_v45  ;;  %v1057_v13 = vpop.f32.mrf.mxu0 }
 0x308   : > { %v1069_v47 = vmul.f32 0.17677669, %v1057_v13 }
 0x309   : > { %1760 = vmatprep.mubr.msk.bf16.mxu1 %vm512_vm0, %v682_v12  ;;  %v864_v48 = vpop.permute.xlu0 %863 }
 0x30a   : > { %1761 = vmatmul.mubr.msk.bf16.vlgmr.msra.gmra.mxu1 %vm512_vm0, %v683_v46  ;;  %v866_v50 = vpop.permute.xlu1 %865  ;;  %v1074_v54 = vsel %vm576_vm1, %v1069_v47, -inf }
 0x30b   : > { %v875_v55 = vand.u32 %v866_v50, %v2110_v51  ;;  %1078 = vmax.xlane.f32.xlu0 %v1077_v52  ;;  %1075 = vmax.xlane.f32.xlu1 %v1074_v54 }
 0x30d   : > { %1772 = vmatprep.subr.bf16.mxu1 %v875_v55  ;;  %v1244_v56 = vpop.permute.xlu0 %1243 }
 0x30e   : > { %1773 = vmatpush3.bf16.msra.mxu1 %v875_v55  ;;  %v1250_v57 = vpop.permute.xlu1 %1249  ;;  %1816 = vmatprep.mubr.msk.bf16.mxu0 %vm512_vm0, %v1244_v56 }
 0x30f   : > { %v1261_v58 = vsel %vm512_vm0, %v1250_v57, 0  ;;  %1842 = vmatprep.subr.msk.bf16.mxu0 %vm512_vm0, %v1250_v57  ;;  %1774 = vmatprep.subr.bf16.mxu1 %v864_v48  ;;  %v1911_v59 = vpop.eup %1910 }
 0x310   : > { %1813 = vmatpush3.bf16.xpose.msra.mxu0 %v1261_v58  ;;  %v860_v0 = vmul.f32 %v1911_v59, %v2135_v27 }
 0x312   : > { %v1248_v60 = vpop.permute.xlu1 %1247  ;;  %1775 = vmatpush3.bf16.msra.mxu1 %v864_v48  ;;  %v862_v4 = vpack.c.bf16 %v860_v0, %v860_v0 }
 0x313   : > { %v1913_v61 = vpop.eup %1912  ;;  %1843 = vmatprep.subr.msk.bf16.mxu0 %vm512_vm0, %v1248_v60  ;;  %v1258_v1 = vsel %vm512_vm0, %v1248_v60, 0  ;;  %1780 = vmatprep.subr.bf16.mxu1 %v1886_v6 }
 0x314   : > { %v1915_v62 = vpop.eup %1914  ;;  %v858_v63 = vmul.f32 %v1913_v61, %v2139_v29 }
 0x315   : > { %v859_v2 = vmul.f32 %v1915_v62, %v2141_v30 }
 0x316   : > { %v1246_v5 = vpop.permute.xlu1 %1245 }
 0x317   : > { %v861_v3 = vpack.c.bf16 %v859_v2, %v858_v63 }
 0x318   : > { %1815 = vmatpush3.bf16.xpose.msra.mxu0 %v1258_v1 }
 0x319   : > { %1776 = vmatprep.mubr.msk.bf16.mxu1 %vm576_vm1, %v861_v3 }
 0x31a   : > { %1777 = vmatmul.mubr.msk.bf16.vlgmr.msra.gmra.mxu1 %vm576_vm1, %v862_v4 }
 0x31b   : > { %1781 = vmatpush3.bf16.msra.mxu1 %v1886_v6 }
 0x31c   : > { %1782 = vmatprep.subr.bf16.mxu1 %v1887_v7 }
 0x31f   : > { %1817 = vmatmul.mubr.msk.bf16.vlgmr.msra.gmra.mxu0 %vm512_vm0, %v1246_v5  ;;  %1783 = vmatpush3.bf16.msra.mxu1 %v1887_v7 }
 0x390   : > { %v1073_v8 = vpop.xlane.xlu0 %1072 }
 0x391   : > { %v1080_v11 = vsub.f32 %v1068_v40, %v1073_v8 }
 0x393   : > { %v1083_v18 = vmul.f32 1.442695, %v1080_v11 }
 0x394   : > { %v1079_v14 = vpop.xlane.xlu0 %1078  ;;  %v1076_v15 = vpop.xlane.xlu1 %1075 }
 0x395   : > { %v1082_v16 = vsub.f32 %v1070_v43, %v1079_v14  ;;  %v1081_v17 = vsub.f32 %v1069_v47, %v1076_v15  ;;  %v1888_v15 = vld [vmem:[%s2272_s3 + $0x28] sm:$0xff]  }
 0x397   : > { %v1087_v19 = vmul.f32 1.442695, %v1082_v16  ;;  %v1085_v20 = vmul.f32 1.442695, %v1081_v17  ;;  %v1889_v16 = vld [vmem:[%s2272_s3 + $0x20] sm:$0xff]  }
 0x398   : > { %v473_v17 = vld [vmem:[%s464_s21 + $0x8] sm:$0x1] }
 0x399   : > { %1916 = vpow2.f32 %v1087_v19  ;;  %v476_v19 = vunpack.c.l.bf16 %v473_v17 }
 0x39a   : > { %1918 = vpow2.f32 %v1085_v20  ;;  %v1636_v20 = vld [vmem:[%s2273_s4] ss:$0 sm:$0xff] }
 0x39b   : > { %1920 = vpow2.f32 %v1083_v18  ;;  %v1684_v18 = vld [vmem:[%s464_s21] sm:$0xff]  }
 0x3a6   : > { %v1917_v21 = vpop.eup %1916 }
 0x3a7   : > { %v1919_v22 = vpop.eup %1918  ;;  %v1095_v23 = vsel %vm583_vm2, %v1917_v21, 0.0 }
 0x3a8   : > { %v1921_v24 = vpop.eup %1920  ;;  %1096 = vadd.xlane.f32.xlu0 %v1095_v23  ;;  %v1092_v25 = vsel %vm576_vm1, %v1919_v22, 0.0 }
 0x3a9   : > { %1093 = vadd.xlane.f32.xlu1 %v1092_v25  ;;  %v1089_v26 = vsel %vm576_vm1, %v1921_v24, 0.0 }
 0x3ac   : > { %1090 = vadd.xlane.f32.xlu0 %v1089_v26 }
 0x3ba   : > { %1108 = vrot.lane.b32.xlu1 %v2107_v49, %s1965_s13 }
 0x3c2   : > { %1106 = vrot.lane.b32.xlu0 %v2118_v53, %s1965_s13 }
 0x3ca   : > { %v2195_v27 = vpop.f32.mrf.mxu1 }
 0x3cc   : > { %v2197_v28 = vpop.f32.mrf.mxu1 }
 0x3ce   : > { %v1763_v29 = vpop.f32.mrf.mxu1 }
 0x3d0   : > { %v2199_v30 = vpop.f32.mrf.mxu1 }
 0x3da   : > { %v1778_v31 = vpop.f32.mrf.mxu1 }
 0x3db   : > { %v926_v38 = vpack.c.bf16 %v1778_v31, %v1778_v31 }
 0x3dc   : > { %v911_v32 = vpop.f32.mrf.mxu1 }
 0x3de   : > { %v1779_v33 = vpop.f32.mrf.mxu1 }
 0x3df   : > { %v1818_v34 = vpop.f32.mrf.mxu0 }
 0x3e0   : > { %v914_v35 = vpop.f32.mrf.mxu1  ;;  %v1313_v9 = vmul.f32 0.17677669, %v1818_v34 }
 0x3e1   : > { %v925_v36 = vpack.c.bf16 %v914_v35, %v911_v32  ;;  %v1297_v37 = vpop.f32.mrf.mxu0 }
 0x3e2   : > { %v1311_v39 = vmul.f32 0.17677669, %v1297_v37  ;;  %v1320_v10 = vsel %vm583_vm2, %v1313_v9, -inf }
 0x3e3   : > { %1784 = vmatprep.mubr.msk.bf16.mxu1 %vm512_vm0, %v925_v36  ;;  %v1819_v40 = vpop.f32.mrf.mxu0 }
 0x3e4   : > { %1785 = vmatmul.mubr.msk.bf16.vlgmr.msra.gmra.mxu1 %vm512_vm0, %v926_v38  ;;  %v1314_v41 = vsel %vm576_vm1, %v1311_v39, -inf }
 0x3e5   : > { %v1300_v42 = vpop.f32.mrf.mxu0  ;;  %1315 = vmax.xlane.f32.xlu1 %v1314_v41 }
 0x3e6   : > { %v1312_v43 = vmul.f32 0.17677669, %v1300_v42 }
 0x3e8   : > { %v1317_v44 = vsel %vm576_vm1, %v1312_v43, -inf }
 0x3e9   : > { %1318 = vmax.xlane.f32.xlu0 %v1317_v44  ;;  %1321 = vmax.xlane.f32.xlu1 %v1320_v10 }
 0x431   : > { %v1097_v45 = vpop.xlane.xlu0 %1096 }
 0x432   : > { %v1094_v12 = vpop.xlane.xlu1 %1093  ;;  %1922 = vrcp.f32 %v1097_v45 }
 0x433   : > { %1924 = vrcp.f32 %v1094_v12 }
 0x435   : > { %v1091_v13 = vpop.xlane.xlu0 %1090 }
 0x436   : > { %1926 = vrcp.f32 %v1091_v13  ;;  %v1109_v46 = vpop.permute.xlu1 %1108 }
 0x437   : > { %v1118_v47 = vand.u32 %v1109_v46, %v2110_v51 }
 0x439   : > { %1796 = vmatprep.subr.bf16.mxu1 %v1118_v47  ;;  %v1107_v48 = vpop.permute.xlu0 %1106 }
 0x43a   : > { %1797 = vmatpush3.bf16.msra.mxu1 %v1118_v47  ;;  %v1891_v47 = vld [vmem:[%s2272_s3 + $0x30] sm:$0xff]  }
 0x43b   : > { %1798 = vmatprep.subr.bf16.mxu1 %v1107_v48 }
 0x43e   : > { %1799 = vmatpush3.bf16.msra.mxu1 %v1107_v48  ;;  %v1686_v48 = vunpack.c.h.bf16 %v1684_v18 }
 0x43f   : > { %v1923_v50 = vpop.eup %1922  ;;  %1804 = vmatprep.subr.bf16.mxu1 %v1888_v15 }
 0x440   : > { %v1925_v52 = vpop.eup %1924  ;;  %v1103_v55 = vmul.f32 %v1923_v50, %v1917_v21  ;;  %v1685_v21 = vunpack.c.l.bf16 %v1684_v18  ;;  %v485_v50 = vadd.f32 %v1686_v48, %v1636_v20 }
 0x441   : > { %v1102_v57 = vmul.f32 %v1925_v52, %v1919_v22  ;;  %v486_v22 = vadd.f32 %v1636_v20, %v476_v19 }
 0x442   : > { %v1105_v59 = vpack.c.bf16 %v1103_v55, %v1103_v55  ;;  %v484_v23 = vadd.f32 %v1685_v21, %v1636_v20 }
 0x443   : > { %v1927_v54 = vpop.eup %1926 }
 0x444   : > { %v1101_v56 = vmul.f32 %v1927_v54, %v1921_v24  ;;  %v756_v24 = vadd.f32 %v2195_v27, %v486_v22  ;;  %v754_v26 = vadd.f32 %v2197_v28, %v484_v23 }
 0x446   : > { %v1104_v58 = vpack.c.bf16 %v1102_v57, %v1101_v56  ;;  %v755_v56 = vadd.f32 %v2199_v30, %v485_v50 }
 0x448   : > { %1800 = vmatprep.mubr.msk.bf16.mxu1 %vm576_vm1, %v1104_v58 }
 0x449   : > { %1801 = vmatmul.mubr.msk.bf16.vlgmr.msra.gmra.mxu1 %vm576_vm1, %v1105_v59 }
 0x44a   : > { %1805 = vmatpush3.bf16.msra.mxu1 %v1888_v15 }
 0x44b   : > { %1806 = vmatprep.subr.bf16.mxu1 %v1889_v16 }
 0x44e   : > { %1807 = vmatpush3.bf16.msra.mxu1 %v1889_v16 }
 0x46e   : > { %v1316_v60 = vpop.xlane.xlu1 %1315 }
 0x46f   : > { %v1323_v61 = vsub.f32 %v1311_v39, %v1316_v60 }
 0x471   : > { %v1326_v4 = vmul.f32 1.442695, %v1323_v61 }
 0x472   : > { %v1319_v62 = vpop.xlane.xlu0 %1318  ;;  %v1322_v63 = vpop.xlane.xlu1 %1321 }
 0x473   : > { %v1324_v0 = vsub.f32 %v1312_v43, %v1319_v62  ;;  %v1325_v1 = vsub.f32 %v1313_v9, %v1322_v63 }
 0x475   : > { %v1328_v2 = vmul.f32 1.442695, %v1324_v0  ;;  %v1330_v3 = vmul.f32 1.442695, %v1325_v1 }
 0x477   : > { %1928 = vpow2.f32 %v1328_v2 }
 0x478   : > { %1930 = vpow2.f32 %v1330_v3 }
 0x479   : > { %1932 = vpow2.f32 %v1326_v4 }
 0x484   : > { %v1929_v5 = vpop.eup %1928 }
 0x485   : > { %v1931_v6 = vpop.eup %1930  ;;  %v1335_v7 = vsel %vm576_vm1, %v1929_v5, 0.0 }
 0x486   : > { %1336 = vadd.xlane.f32.xlu1 %v1335_v7  ;;  %v1338_v8 = vsel %vm583_vm2, %v1931_v6, 0.0  ;;  %v1933_v11 = vpop.eup %1932 }
 0x487   : > { %1339 = vadd.xlane.f32.xlu0 %v1338_v8  ;;  %v1332_v14 = vsel %vm576_vm1, %v1933_v11, 0.0 }
 0x48b   : > { %1333 = vadd.xlane.f32.xlu0 %v1332_v14 }
 0x497   : > { %1351 = vrot.lane.b32.xlu1 %v2107_v49, %s1967_s19 }
 0x4a1   : > { %1349 = vrot.lane.b32.xlu0 %v2118_v53, %s1967_s19 }
 0x4a4   : > { %v1786_v25 = vpop.f32.mrf.mxu1 }
 0x4a5   : > { %v999_v29 = vadd.f32 %v1786_v25, %v756_v24 }
 0x4a6   : > { %v983_v49 = vpop.f32.mrf.mxu1 }
 0x4a7   : > { %v997_v31 = vadd.f32 %v983_v49, %v754_v26 }
 0x4a8   : > { %v1787_v32 = vpop.f32.mrf.mxu1 }
 0x4aa   : > { %v986_v33 = vpop.f32.mrf.mxu1 }
 0x4ab   : > { %v998_v59 = vadd.f32 %v986_v33, %v755_v56 }
 0x509   : > { %v1802_v34 = vpop.f32.mrf.mxu1 }
 0x50a   : > { %v1169_v9 = vpack.c.bf16 %v1802_v34, %v1802_v34 }
 0x50b   : > { %v1154_v35 = vpop.f32.mrf.mxu1 }
 0x50d   : > { %v1803_v36 = vpop.f32.mrf.mxu1 }
 0x50f   : > { %v1157_v37 = vpop.f32.mrf.mxu1  ;;  %v1337_v38 = vpop.xlane.xlu1 %1336 }
 0x510   : > { %v1168_v39 = vpack.c.bf16 %v1157_v37, %v1154_v35  ;;  %v1340_v40 = vpop.xlane.xlu0 %1339 }
 0x511   : > { %1934 = vrcp.f32 %v1340_v40 }
 0x512   : > { %1808 = vmatprep.mubr.msk.bf16.mxu1 %vm512_vm0, %v1168_v39  ;;  %1936 = vrcp.f32 %v1337_v38 }
 0x513   : > { %1809 = vmatmul.mubr.msk.bf16.vlgmr.msra.gmra.mxu1 %vm512_vm0, %v1169_v9  ;;  %v1352_v53 = vpop.permute.xlu1 %1351 }
 0x514   : > { %v1334_v27 = vpop.xlane.xlu0 %1333  ;;  %v1361_v28 = vand.u32 %v1352_v53, %v2110_v51  ;;  %v1890_v51 = vld [vmem:[%s2272_s3 + $0x38] sm:$0xff]  }
 0x515   : > { %1938 = vrcp.f32 %v1334_v27 }
 0x516   : > { %1820 = vmatprep.subr.bf16.mxu1 %v1361_v28 }
 0x517   : > { %1821 = vmatpush3.bf16.msra.mxu1 %v1361_v28 }
 0x518   : > { %v1350_v41 = vpop.permute.xlu0 %1349 }
 0x519   : > { %1822 = vmatprep.subr.bf16.mxu1 %v1350_v41 }
 0x51b   : > { %1823 = vmatpush3.bf16.msra.mxu1 %v1350_v41 }
 0x51c   : > { %1828 = vmatprep.subr.bf16.mxu1 %v1890_v51 }
 0x51e   : > { %v1935_v42 = vpop.eup %1934 }
 0x51f   : > { %v1937_v43 = vpop.eup %1936  ;;  %v1346_v10 = vmul.f32 %v1935_v42, %v1931_v6 }
 0x520   : > { %v1345_v12 = vmul.f32 %v1937_v43, %v1929_v5  ;;  %v1504_v5 = vld [vmem:[%s469_s20 + $0x8] sm:$0x1] }
 0x521   : > { %v1348_v46 = vpack.c.bf16 %v1346_v10, %v1346_v10 }
 0x522   : > { %v1939_v44 = vpop.eup %1938 }
 0x523   : > { %v1344_v45 = vmul.f32 %v1939_v44, %v1933_v11 }
 0x525   : > { %v1347_v13 = vpack.c.bf16 %v1345_v12, %v1344_v45 }
 0x527   : > { %1824 = vmatprep.mubr.msk.bf16.mxu1 %vm576_vm1, %v1347_v13 }
 0x528   : > { %1825 = vmatmul.mubr.msk.bf16.vlgmr.msra.gmra.mxu1 %vm576_vm1, %v1348_v46 }
 0x529   : > { %1829 = vmatpush3.bf16.msra.mxu1 %v1890_v51 }
 0x52a   : > { %1830 = vmatprep.subr.bf16.mxu1 %v1891_v47 }
 0x52d   : > { %1831 = vmatpush3.bf16.msra.mxu1 %v1891_v47 }
 0x5d3   : > { %v1810_v52 = vpop.f32.mrf.mxu1 }
 0x5d4   : > { %v1242_v54 = vadd.f32 %v1810_v52, %v999_v29 }
 0x5d5   : > { %v1226_v55 = vpop.f32.mrf.mxu1 }
 0x5d6   : > { %v1240_v57 = vadd.f32 %v1226_v55, %v997_v31 }
 0x5d7   : > { %v1811_v58 = vpop.f32.mrf.mxu1 }
 0x5d9   : > { %v1229_v60 = vpop.f32.mrf.mxu1 }
 0x5da   : > { %v1241_v61 = vadd.f32 %v1229_v60, %v998_v59 }
 0x5e8   : > { %v1826_v62 = vpop.f32.mrf.mxu1 }
 0x5e9   : > { %v1412_v3 = vpack.c.bf16 %v1826_v62, %v1826_v62 }
 0x5ea   : > { %v1397_v63 = vpop.f32.mrf.mxu1 }
 0x5ec   : > { %v1827_v0 = vpop.f32.mrf.mxu1 }
 0x5ee   : > { %v1400_v1 = vpop.f32.mrf.mxu1 }
 0x5ef   : > { %v1411_v2 = vpack.c.bf16 %v1400_v1, %v1397_v63 }
 0x5f1   : > { %1832 = vmatprep.mubr.msk.bf16.mxu1 %vm512_vm0, %v1411_v2 }
 0x5f2   : > { %1833 = vmatmul.mubr.msk.bf16.vlgmr.msra.gmra.mxu1 %vm512_vm0, %v1412_v3 }
 0x6b2   : > { %v1834_v30 = vpop.f32.mrf.mxu1 }
 0x6b3   : > { %v1485_v4 = vadd.f32 %v1834_v30, %v1242_v54 }
 0x6b4   : > { %v1469_v6 = vpop.f32.mrf.mxu1 }
 0x6b5   : > { %v1682_v7 = vpack.c.bf16 %v1485_v4, %v1485_v4  ;;  %v1483_v15 = vadd.f32 %v1469_v6, %v1240_v57 }
 0x6b6   : > { %v1835_v8 = vpop.f32.mrf.mxu1 }
 0x6b7   : > { %v1505_v11 = vsel %vm1503_vm5, %v1682_v7, %v1504_v5 }
 0x6b8   : > { %1506 = vst [vmem:[%s469_s20 + $0x8] sm:$0x1] %v1505_v11  ;;  %v1472_v14 = vpop.f32.mrf.mxu1 }
 0x6b9   : > { %v1484_v16 = vadd.f32 %v1472_v14, %v1241_v61 }
 0x6bb   : > { %v1690_v17 = vpack.c.bf16 %v1484_v16, %v1483_v15 }
 0x6bd   : > { %1691 = vst [vmem:[%s469_s20] sm:$0xff] %v1690_v17  }
 0x6be PF: > { %p13_p9 = scmp.ge.s32.totalorder %s2020_s25, 4   ;;  %s2277_s21 = smov %s1958_s22 }
 0x6bf   : > { %s2278_s22 = smov %s2029_s28  ;;  %s2279_s23 = smov %s2020_s25 }
 0x6c0   :  { %15 = sbr.rel (!%p13_p9) target bundleno = 2 (0x2), region = 221 }

// kernel: vit_forward.14
= control target key start
LH: loop header
LB: loop body
LE: loop exit
PB: predicated region body
PF: predicated region fallthrough
CT: control target
= control target key end

     0   :  { %v451_v23 = vmov 0.0   ;;  %s561_s1 = inlined_call_operand.vmem [shape: bf16[256,128], index: 1, kind: input, shape index: {}]   ;;  %s562_s0 = inlined_call_operand.vmem [shape: bf16[34,256], index: 0, kind: input, shape index: {}]   ;;  %s563_s3 = inlined_call_operand.vmem [shape: bf16[34,128], index: 3, kind: input, shape index: {}]   ;;  %s564_s2 = inlined_call_operand.vmem [shape: f32[1,128], index: 2, kind: input, shape index: {}]   ;;  %s565_s4 = inlined_call_operand.vmem [shape: bf16[34,128], index: 4, kind: output, shape index: {}]  }
   0x1   :  { %v427_v0 = vld [vmem:[%s561_s1 + $0x78] sm:$0xff]   ;;  %v429_v2 = vld [vmem:[%s561_s1 + $0x70] sm:$0xff]   ;;  %v431_v4 = vld [vmem:[%s561_s1 + $0x68] sm:$0xff]   ;;  %26 = vst [vmem:[#allocation2 + $0x18] sm:$0x3] %v451_v23 }
   0x2   :  { %v428_v1 = vld [vmem:[%s561_s1 + $0x38] sm:$0xff]   ;;  %376 = vmatprep.subr.bf16.mxu0 %v427_v0  ;;  %410 = vmatprep.subr.bf16.mxu1 %v427_v0  ;;  %v430_v3 = vld [vmem:[%s561_s1 + $0x30] sm:$0xff]   ;;  %v432_v5 = vld [vmem:[%s561_s1 + $0x28] sm:$0xff]  }
   0x3   :  { %377 = vmatpush3.bf16.msra.mxu0 %v428_v1  ;;  %418 = vmatpush3.bf16.msra.mxu1 %v428_v1  ;;  %v433_v6 = vld [vmem:[%s561_s1 + $0x60] sm:$0xff]   ;;  %v435_v8 = vld [vmem:[%s561_s1 + $0x58] sm:$0xff]   ;;  %v437_v10 = vld [vmem:[%s561_s1 + $0x50] sm:$0xff]  }
   0x4   :  { %378 = vmatprep.subr.bf16.mxu0 %v429_v2  ;;  %411 = vmatprep.subr.bf16.mxu1 %v429_v2  ;;  %v434_v7 = vld [vmem:[%s561_s1 + $0x20] sm:$0xff]   ;;  %v436_v9 = vld [vmem:[%s561_s1 + $0x18] sm:$0xff]   ;;  %v438_v13 = vld [vmem:[%s561_s1 + $0x10] sm:$0xff]  }
   0x5   :  { %v445_v11 = vld [vmem:[%s562_s0 + $0x4] ss:$8 sps:$4 sm:$0xff]   ;;  %v448_v12 = vld [vmem:[%s562_s0 + $0x14] ss:$8 sps:$4 sm:$0xff]   ;;  %v443_v19 = vld [vmem:[%s562_s0] ss:$8 sps:$4 sm:$0xff]  }
   0x6   :  { %v439_v14 = vld [vmem:[%s561_s1 + $0x48] sm:$0xff]   ;;  %224 = vmatprep.mubr.bf16.mxu0 %v445_v11  ;;  %232 = vmatprep.mubr.bf16.mxu1 %v448_v12  ;;  %v441_v16 = vld [vmem:[%s561_s1 + $0x40] sm:$0xff]   ;;  %v446_v20 = vld [vmem:[%s562_s0 + $0x10] ss:$8 sps:$4 sm:$0xff]  }
   0x7   :  { %379 = vmatpush3.bf16.msra.mxu0 %v430_v3  ;;  %419 = vmatpush3.bf16.msra.mxu1 %v430_v3  ;;  %v440_v15 = vld [vmem:[%s561_s1 + $0x8] sm:$0xff]   ;;  %v442_v17 = vld [vmem:[%s561_s1] sm:$0xff]   ;;  %v282_v60 = vld [vmem:[%s563_s3 + $0x10] sm:$0x1] }
   0x8   :  { %380 = vmatprep.subr.bf16.mxu0 %v431_v4  ;;  %412 = vmatprep.subr.bf16.mxu1 %v431_v4  ;;  %v36_v18 = vld [vmem:[%s562_s0 + $0x20] sm:$0x11]  ;;  %v374_v33 = vld [vmem:[%s563_s3 + $0x8] sm:$0xff]   ;;  %v31_v46 = vld [vmem:[#allocation2 + $0x18] sm:$0x3]  ;;  %v287_v61 = vunpack.c.l.bf16 %v282_v60 }
   0x9   :  { %v328_v21 = vcombine.high %v36_v18, %v36_v18  ;;  %v327_v22 = vcombine.low %v36_v18, %v36_v18  ;;  %v357_v30 = vld [vmem:[%s563_s3] sm:$0xff]   ;;  %v362_v41 = vunpack.c.l.bf16 %v374_v33  ;;  %v363_v45 = vunpack.c.h.bf16 %v374_v33 }
   0xa   :  { %v345_v34 = vld [vmem:[%s564_s2] ss:$0 sm:$0xff]  ;;  %v358_v38 = vunpack.c.l.bf16 %v357_v30  ;;  %v359_v42 = vunpack.c.h.bf16 %v357_v30 }
   0xb   :  { %381 = vmatpush3.bf16.msra.mxu0 %v432_v5  ;;  %420 = vmatpush3.bf16.msra.mxu1 %v432_v5 }
   0xc   :  { %382 = vmatprep.subr.bf16.mxu0 %v433_v6  ;;  %413 = vmatprep.subr.bf16.mxu1 %v433_v6 }
   0xf   :  { %383 = vmatpush3.bf16.msra.mxu0 %v434_v7  ;;  %421 = vmatpush3.bf16.msra.mxu1 %v434_v7 }
  0x10   :  { %384 = vmatprep.subr.bf16.mxu0 %v435_v8  ;;  %414 = vmatprep.subr.bf16.mxu1 %v435_v8 }
  0x13   :  { %385 = vmatpush3.bf16.msra.mxu0 %v436_v9  ;;  %422 = vmatpush3.bf16.msra.mxu1 %v436_v9 }
  0x14   :  { %386 = vmatprep.subr.bf16.mxu0 %v437_v10  ;;  %415 = vmatprep.subr.bf16.mxu1 %v437_v10 }
  0x17   :  { %387 = vmatpush3.bf16.msra.mxu0 %v438_v13  ;;  %423 = vmatpush3.bf16.msra.mxu1 %v438_v13 }
  0x18   :  { %388 = vmatprep.subr.bf16.mxu0 %v439_v14  ;;  %416 = vmatprep.subr.bf16.mxu1 %v439_v14 }
  0x1b   :  { %389 = vmatpush3.bf16.msra.mxu0 %v440_v15  ;;  %424 = vmatpush3.bf16.msra.mxu1 %v440_v15 }
  0x1c   :  { %390 = vmatprep.subr.bf16.mxu0 %v441_v16  ;;  %417 = vmatprep.subr.bf16.mxu1 %v441_v16 }
  0x1f   :  { %391 = vmatpush3.bf16.msra.mxu0 %v442_v17  ;;  %425 = vmatpush3.bf16.msra.mxu1 %v442_v17 }
  0x22   :  { %225 = vmatmul.mubr.bf16.vlgmr.msra.gmra.mxu0 %v443_v19  ;;  %233 = vmatmul.mubr.bf16.vlgmr.msra.gmra.mxu1 %v446_v20 }
  0x23   :  { %240 = vmatprep.mubr.bf16.mxu1 %v328_v21 }
  0x2a   :  { %241 = vmatmul.mubr.bf16.gmra.mxu1 %v327_v22 }
  0xe2   :  { %v392_v24 = vpop.f32.mrf.mxu0  ;;  %v398_v25 = vpop.f32.mrf.mxu1 }
  0xe4   :  { %v393_v26 = vpop.f32.mrf.mxu0  ;;  %v399_v27 = vpop.f32.mrf.mxu1 }
  0xe5   :  { %v394_v28 = vadd.f32 %v393_v26, %v392_v24  ;;  %v400_v29 = vadd.f32 %v399_v27, %v398_v25 }
  0xe6   :  { %v395_v31 = vpop.f32.mrf.mxu0  ;;  %v401_v32 = vpop.f32.mrf.mxu1 }
  0xe7   :  { %v273_v37 = vadd.f32 %v394_v28, %v345_v34  ;;  %v275_v44 = vadd.f32 %v400_v29, %v345_v34 }
  0xe8   :  { %v396_v35 = vpop.f32.mrf.mxu0  ;;  %v402_v36 = vpop.f32.mrf.mxu1 }
  0xe9   :  { %v397_v39 = vadd.f32 %v396_v35, %v395_v31  ;;  %v403_v40 = vadd.f32 %v402_v36, %v401_v32  ;;  %v288_v48 = vadd.f32 %v358_v38, %v273_v37  ;;  %v290_v53 = vadd.f32 %v362_v41, %v275_v44 }
  0xea   :  { %v404_v43 = vpop.f32.mrf.mxu1 }
  0xeb   :  { %v274_v49 = vadd.f32 %v397_v39, %v345_v34  ;;  %v276_v50 = vadd.f32 %v403_v40, %v345_v34 }
  0xec   :  { %v405_v47 = vpop.f32.mrf.mxu1 }
  0xed   :  { %v406_v51 = vadd.f32 %v405_v47, %v404_v43  ;;  %v289_v54 = vadd.f32 %v359_v42, %v274_v49  ;;  %v291_v55 = vadd.f32 %v363_v45, %v276_v50 }
  0xee   :  { %v407_v52 = vpop.f32.mrf.mxu1 }
  0xef   :  { %v252_v56 = vadd.f32 %v406_v51, %v31_v46  ;;  %v367_v58 = vpack.c.bf16 %v289_v54, %v288_v48  ;;  %v372_v59 = vpack.c.bf16 %v291_v55, %v290_v53 }
  0xf0   :  { %v408_v57 = vpop.f32.mrf.mxu1 }
  0xf1   :  { %257 = vst [vmem:[#allocation2 + $0x18] sm:$0x3] %v252_v56  ;;  %368 = vst [vmem:[%s565_s4] sm:$0xff] %v367_v58  }
  0xf2   :  { %375 = vst [vmem:[%s565_s4 + $0x8] sm:$0xff] %v372_v59  }
  0xf8   :  { %v265_v62 = vld [vmem:[#allocation2 + $0x18] sm:$0x3] }
  0xf9   :  { %v277_v63 = vadd.f32 %v345_v34, %v265_v62 }
  0xfb   :  { %v292_v0 = vadd.f32 %v287_v61, %v277_v63 }
  0xfd   :  { %v355_v1 = vpack.c.bf16 %v292_v0, %v292_v0 }
  0xff   :  { %318 = vst [vmem:[%s565_s4 + $0x10] sm:$0x1] %v355_v1 }

// kernel: vit_forward.19
= control target key start
LH: loop header
LB: loop body
LE: loop exit
PB: predicated region body
PF: predicated region fallthrough
CT: control target
= control target key end

     0   :  { %vm26_vm0 = vcmask 1041408   ;;  %s332_s0 = inlined_call_operand.vmem [shape: bf16[2,128], index: 0, kind: input, shape index: {}]   ;;  %s333_s1 = inlined_call_operand.vmem [shape: f32[1,128], index: 1, kind: input, shape index: {}]   ;;  %s334_s2 = inlined_call_operand.vmem [shape: f32[1,128], index: 2, kind: input, shape index: {}]   ;;  %s335_s3 = inlined_call_operand.vmem [shape: bf16[128,10], index: 3, kind: input, shape index: {}]   ;;  %s336_s4 = inlined_call_operand.vmem [shape: f32[1,10], index: 4, kind: input, shape index: {}]   ;;  %s337_s5 = inlined_call_operand.hbm [shape: f32[2,10], index: 5, kind: output, shape index: {}]  }
   0x1   :  { %v22_v0 = vld [vmem:[%s332_s0] sm:$0x1] }
   0x2   :  { %v23_v1 = vunpack.c.l.bf16 %v22_v0 }
   0x4   :  { %v27_v2 = vsel %vm26_vm0, %v23_v1, 0.0 }
   0x5   :  { %28 = vadd.xlane.f32.xlu0 %v27_v2 }
   0x6   :  { %10 = vsyncpa [#allocation3], 0  ;;  %v226_v3 = vld [vmem:[%s335_s3 + $0x38] sm:$0xff]   ;;  %v258_v4 = vmov 0.0   ;;  %v227_v5 = vld [vmem:[%s335_s3 + $0x30] sm:$0xff]   ;;  %vm259_vm1 = vmmov 0  }
   0x7   :  { %203 = vmatprep.subr.bf16.mxu0 %v258_v4  ;;  %v228_v11 = vld [vmem:[%s335_s3 + $0x28] sm:$0xff]   ;;  %v229_v12 = vld [vmem:[%s335_s3 + $0x20] sm:$0xff]   ;;  %219 = vmatprep.mubr.msk.bf16.mxu0 %vm259_vm1, %v258_v4  ;;  %v230_v13 = vld [vmem:[%s335_s3 + $0x18] sm:$0xff]   ;;  %s260_s15 = smov [#allocation2]   ;;  %vm167_vm2 = vcmask 74752  }
   0x8   :  { %204 = vmatpush3.bf16.msra.mxu0 %v226_v3  ;;  %v231_v14 = vld [vmem:[%s335_s3 + $0x10] sm:$0xff]   ;;  %v232_v15 = vld [vmem:[%s335_s3 + $0x8] sm:$0xff]   ;;  %v233_v16 = vld [vmem:[%s335_s3] sm:$0xff]   ;;  %s175_s16 = sshll.u32 %s260_s15, 4  ;;  %s176_s16 = int_to_ptr.vmem [resolvable:$true] %s175_s16 }
   0x9   :  { %205 = vmatprep.subr.bf16.mxu0 %v258_v4  ;;  %v183_v21 = vld [vmem:[%s333_s1] ss:$0 sm:$0xff]  ;;  %s236_s1 = scalar_lea.vmem %s176_s16, 32  ;;  %p241_p1 = scmp.lt.s32.totalorder %s176_s16, %s176_s16 }
   0xa   :  { %v184_v23 = vld [vmem:[%s334_s2] ss:$0 sm:$0xff]  ;;  %p237_p0 = scmp.ne.s32.totalorder %s176_s16, %s236_s1  ;;  %p242_p2 = scmp.lt.s32.totalorder %s236_s1, %s236_s1 }
   0xb   :  { %v185_v27 = vld [vmem:[%s336_s4] ss:$0 sm:$0xff] }
   0xc   :  { %206 = vmatpush3.bf16.msra.mxu0 %v227_v5  ;;  %p243_p3 = por %p242_p2, %p241_p1 }
   0xd   :  { %207 = vmatprep.subr.bf16.mxu0 %v258_v4 }
   0xe   :  { %p244_p4 = pnand %p243_p3, %p237_p0 }
  0x10   :  { %208 = vmatpush3.bf16.msra.mxu0 %v228_v11 }
  0x11   :  { %209 = vmatprep.subr.bf16.mxu0 %v258_v4 }
  0x14   :  { %210 = vmatpush3.bf16.msra.mxu0 %v229_v12 }
  0x15   :  { %211 = vmatprep.subr.bf16.mxu0 %v258_v4 }
  0x18   :  { %212 = vmatpush3.bf16.msra.mxu0 %v230_v13 }
  0x19   :  { %213 = vmatprep.subr.bf16.mxu0 %v258_v4 }
  0x1c   :  { %214 = vmatpush3.bf16.msra.mxu0 %v231_v14 }
  0x1d   :  { %215 = vmatprep.subr.bf16.mxu0 %v258_v4 }
  0x20   :  { %216 = vmatpush3.bf16.msra.mxu0 %v232_v15 }
  0x21   :  { %217 = vmatprep.subr.bf16.mxu0 %v258_v4 }
  0x24   :  { %218 = vmatpush3.bf16.msra.mxu0 %v233_v16 }
  0x8e   :  { %v29_v6 = vpop.xlane.xlu0 %28 }
  0x8f   :  { %v31_v7 = vmul.f32 0.0078125, %v29_v6 }
  0x91   :  { %v32_v8 = vsub.f32 %v23_v1, %v31_v7 }
  0x93   :  { %v33_v9 = vmul.f32 %v32_v8, %v32_v8 }
  0x95   :  { %v34_v10 = vsel %vm26_vm0, %v33_v9, 0.0 }
  0x96   :  { %35 = vadd.xlane.f32.xlu0 %v34_v10 }
 0x11f   :  { %v36_v17 = vpop.xlane.xlu0 %35 }
 0x120   :  { %v37_v18 = vmul.f32 0.0078125, %v36_v17 }
 0x122   :  { %v38_v19 = vadd.f32 1e-05, %v37_v18 }
 0x124   :  { %234 = vrsqrt.f32 %v38_v19 }
 0x131   :  { %v235_v20 = vpop.eup %234 }
 0x132   :  { %v40_v22 = vmul.f32 %v235_v20, %v32_v8 }
 0x134   :  { %v47_v24 = vmul.f32 %v183_v21, %v40_v22 }
 0x136   :  { %v54_v25 = vadd.f32 %v184_v23, %v47_v24 }
 0x138   :  { %v55_v26 = vpack.c.bf16 %v54_v25, %v54_v25 }
 0x13a   :  { %220 = vmatmul.mubr.bf16.vlgmr.msra.gmra.mxu0 %v55_v26 }
 0x1fa   :  { %v161_v28 = vpop.f32.mrf.mxu0 }
 0x1fb   :  { %v162_v29 = vadd.f32 %v185_v27, %v161_v28 }
 0x1fc   :  { %v221_v30 = vpop.f32.mrf.mxu0 }
 0x1fd   :  { %168 = vst.msk [vmem:[#allocation2] sm:$0x3] %vm167_vm2, %v162_v29 }
 0x1fe   :  { %v164_v31 = vpop.f32.mrf.mxu0 }
 0x1ff   :  { %247 = shalt.err (!%p244_p4)
}
 0x200   :  { %178 = dma.vmem_to_hbm [thread:$0]  %s176_s16, 32, %s337_s5, [#allocation3]   ;;  %v222_v32 = vpop.f32.mrf.mxu0 }
 0x201   :  { %256 = dma.done.wait [#allocation3], 32  }
 0x202   :  { %257 = vsyncadd [#allocation3], 4294967264 }
 0x203   :  { %182 = vsyncpa [#allocation3], 1 }

</bundles_post_ra>
